<compile_context>
chip_gen: v6e
topology: v6e:2x2x1
jax: 0.10.0
libtpu: 0.0.40
codegen_flags: <defaults>
</compile_context>

<pallas_src>
import functools

import jax
import jax.numpy as jnp
from jax.experimental import pallas as pl
from jax.experimental.pallas import tpu as pltpu

_EPS = 1e-5                      # PyTorch BatchNorm2d default
_INTERM_DTYPE = jnp.bfloat16     # MXU operands + inter-stage HBM tensors


# ------------------------------ small helpers ------------------------------- #

def _pow2_128(n):
    """Smallest power-of-two multiple of 128 that is >= n."""
    t = 128
    while t < n:
        t *= 2
    return t


def _stack_taps(w_oihw):
    """PyTorch OIHW 3x3 weight -> (Cout, 9*Cin) tap-stacked matrix.

    Column order is tap-major / input-channel-minor, matching the slab built in
    the kernels (k = ky*3 + kx).
    """
    co, ci = w_oihw.shape[:2]
    return (jnp.transpose(w_oihw, (0, 2, 3, 1))
            .reshape(co, 9 * ci).astype(_INTERM_DTYPE))


def _bn_fold(s, sq, gamma, beta, count, eps):
    """Fold per-(image, tile) masked sums / sums-of-squares into the fused
    training-mode BN scale/bias (biased variance).  Conv outputs here are
    near zero-mean and O(1), so E[y^2]-E[y]^2 has no cancellation problem."""
    s_tot = jnp.sum(s, axis=(0, 1))[:, 0]          # (C,)
    sq_tot = jnp.sum(sq, axis=(0, 1))[:, 0]        # (C,)
    mean = s_tot / count
    var = jnp.maximum(sq_tot / count - mean * mean, 0.0)
    scale = gamma * jax.lax.rsqrt(var + eps)
    bias = beta - mean * scale
    return scale.reshape(-1, 1).astype(jnp.float32), bias.reshape(-1, 1).astype(jnp.float32)


def _vmem_limit(cin, cout, t, hb):
    """Per-grid-step VMEM footprint estimate -> explicit scoped-VMEM limit."""
    bpe = jnp.dtype(_INTERM_DTYPE).itemsize
    pipelined = 2 * (cin * (t + hb) * bpe          # input cur + halo tiles
                     + (t + hb) * 4                # mask cur + halo rows (f32)
                     + cout * t * bpe              # output tile
                     + 2 * cout * 4)               # stats outputs
    resident = 2 * (cout * 9 * cin * bpe           # tap-stacked weights
                    + 2 * cout * 4)                # scale / bias columns
    temps = (cin * (t + hb) * 4                    # f32 window
             + 9 * cin * t * (4 + bpe)             # slab build (f32) + bf16 slab
             + cout * t * 4)                       # f32 accumulator
    est = pipelined + resident + temps
    return int(min(max(2 * est + (2 << 20), 32 << 20), 64 << 20))


# ------------------------------ Pallas kernels ------------------------------ #

def _build_slab(xwin_f32, wp, t):
    """(C, t+hb) f32 window -> (9*C, t) bf16 tap-stacked slab.

    Nine statically shifted lane slices stacked along sublanes so the whole
    3x3 conv becomes one (Cout, 9*C) x (9*C, t) MXU matmul (tap accumulation
    happens inside the MXU)."""
    pieces = []
    for ky in range(3):
        for kx in range(3):
            st = ky * wp + kx
            pieces.append(xwin_f32[:, st:st + t])
    return jnp.concatenate(pieces, axis=0).astype(_INTERM_DTYPE)


def _emit(acc, mask_out, y_ref, s_ref, sq_ref):
    """Store the unnormalized conv tile + masked per-tile BN statistics."""
    sel = jnp.where(mask_out, acc, 0.0)
    s_ref[...] = jnp.sum(sel, axis=1, keepdims=True)
    sq_ref[...] = jnp.sum(sel * sel, axis=1, keepdims=True)
    y_ref[...] = acc.astype(y_ref.dtype)           # full-block, lane-dense store


def _conv1_kernel(x_cur_ref, x_halo_ref, w_ref, m_cur_ref,
                  y_ref, s_ref, sq_ref, *, wp, t):
    """conv1 over cat([x2, x1]) (concat already folded into the tap stack)."""
    xwin = jnp.concatenate([x_cur_ref[...].astype(jnp.float32),
                            x_halo_ref[...].astype(jnp.float32)], axis=1)
    slab = _build_slab(xwin, wp, t)
    acc = jnp.dot(w_ref[...], slab, preferred_element_type=jnp.float32)
    _emit(acc, m_cur_ref[...] > 0.5, y_ref, s_ref, sq_ref)


def _bn_relu_conv_kernel(y_cur_ref, y_halo_ref, scale_ref, bias_ref, w_ref,
                         m_cur_ref, m_halo_ref,
                         y_ref, s_ref, sq_ref, *, wp, t, e):
    """Fused BN1(scale,bias)+ReLU on the unnormalized conv1 output, then conv2.

    The interior mask zeroes the pad ring / flat extension, which reproduces
    conv2's zero padding exactly."""
    ywin = jnp.concatenate([y_cur_ref[...].astype(jnp.float32),
                            y_halo_ref[...].astype(jnp.float32)], axis=1)
    mwin = jnp.concatenate([m_cur_ref[...], m_halo_ref[...]], axis=1)
    a = scale_ref[...] * ywin + bias_ref[...]
    a = jnp.where(mwin > 0.5, jnp.maximum(a, 0.0), 0.0)
    slab = _build_slab(a, wp, t)
    acc = jnp.dot(w_ref[...], slab, preferred_element_type=jnp.float32)
    _emit(acc, mwin[:, e:e + t] > 0.5, y_ref, s_ref, sq_ref)


# ------------------------------ forward pass -------------------------------- #

def double_conv_up(x1_nchw, x2_nchw, params, *, eps=_EPS):
    """Pallas implementation of double_conv_up.forward(x1, x2); I/O is NCHW.

    params['b1'] / params['b2'] are intentionally unused: under training-mode
    BatchNorm a per-channel conv bias cancels exactly.
    """
    n, c2, h, w = x2_nchw.shape
    _, c1, h1, w1 = x1_nchw.shape
    cin = c1 + c2
    cout = params["w1"].shape[0]

    hpad, wpad = h + 2, w + 2            # one zero ring for the 3x3 convs
    lp = hpad * wpad                     # flat padded-image length
    e = wpad + 1                         # flat halo of one 3x3 conv (row + col)
    t = _pow2_128(max(512, 2 * e))       # lane tile (multiple of 128)
    hb = _pow2_128(2 * e)                # halo block (multiple of 128, divides t)
    r = t // hb                          # halo block-index stride
    g2 = -(-lp // t)                     # conv2 / output tiles
    g1 = g2 + 1                          # conv1 writes one extra tile so every
                                         # halo read of stage 2 is initialized
    l1 = g1 * t                          # y1 length   (lane q <-> image pos q - e)
    l0 = g1 * t + hb                     # x_in length (lane r <-> image pos r - 2e)
    count = float(n * h * w)             # BN element count

    # ---- host prep: zero pads + channel concat (one fused XLA pass, no im2col) ----
    dy, dx = h - h1, w - w1
    x1p = jnp.pad(x1_nchw, ((0, 0), (0, 0),
                            (dy // 2, dy - dy // 2), (dx // 2, dx - dx // 2)))
    xcat = jnp.concatenate([x2_nchw, x1p], axis=1)            # torch.cat fused here
    xpad = jnp.pad(xcat, ((0, 0), (0, 0), (1, 1), (1, 1)))    # conv zero ring
    x_in = jnp.pad(xpad.reshape(n, cin, lp),
                   ((0, 0), (0, 0), (2 * e, l0 - lp - 2 * e))).astype(_INTERM_DTYPE)

    # shared interior mask in the y1 geometry (1 = real pixel, 0 = pad/extension)
    pos = jnp.arange(lp, dtype=jnp.int32)
    hh, ww = pos // wpad, pos % wpad
    interior = ((hh >= 1) & (hh <= h) & (ww >= 1) & (ww <= w)).astype(jnp.float32)
    m1 = jnp.pad(interior, (e, l1 - lp - e)).reshape(1, l1)

    # tap-stacked weights (host-side reshape; conv1's stack covers both groups)
    w1s = _stack_taps(params["w1"])      # (cout, 9*cin)
    w2s = _stack_taps(params["w2"])      # (cout, 9*cout)

    par = ("parallel", "parallel")

    # ---- stage 1: conv1 -> unnormalized y1 (bf16) + per-tile BN1 statistics ----
    stat1 = jax.ShapeDtypeStruct((n, g1, cout, 1), jnp.float32)
    y1, s1, sq1 = pl.pallas_call(
        functools.partial(_conv1_kernel, wp=wpad, t=t),
        grid=(n, g1),
        in_specs=[
            pl.BlockSpec((None, cin, t), lambda i, j: (i, 0, j)),
            pl.BlockSpec((None, cin, hb), lambda i, j: (i, 0, (j + 1) * r)),
            pl.BlockSpec((cout, 9 * cin), lambda i, j: (0, 0)),
            pl.BlockSpec((1, t), lambda i, j: (0, j)),
        ],
        out_specs=[
            pl.BlockSpec((None, cout, t), lambda i, j: (i, 0, j)),
            pl.BlockSpec((None, None, cout, 1), lambda i, j: (i, j, 0, 0)),
            pl.BlockSpec((None, None, cout, 1), lambda i, j: (i, j, 0, 0)),
        ],
        out_shape=[jax.ShapeDtypeStruct((n, cout, l1), _INTERM_DTYPE), stat1, stat1],
        compiler_params=pltpu.CompilerParams(
            dimension_semantics=par,
            vmem_limit_bytes=_vmem_limit(cin, cout, t, hb)),
    )(x_in, x_in, w1s, m1)

    scale1, bias1 = _bn_fold(s1, sq1, params["g1"], params["be1"], count, eps)

    # ---- stage 2: BN1+ReLU fused into conv2 -> unnormalized y2 (bf16) + stats ----
    stat2 = jax.ShapeDtypeStruct((n, g2, cout, 1), jnp.float32)
    y2, s2, sq2 = pl.pallas_call(
        functools.partial(_bn_relu_conv_kernel, wp=wpad, t=t, e=e),
        grid=(n, g2),
        in_specs=[
            pl.BlockSpec((None, cout, t), lambda i, j: (i, 0, j)),
            pl.BlockSpec((None, cout, hb), lambda i, j: (i, 0, (j + 1) * r)),
            pl.BlockSpec((cout, 1), lambda i, j: (0, 0)),
            pl.BlockSpec((cout, 1), lambda i, j: (0, 0)),
            pl.BlockSpec((cout, 9 * cout), lambda i, j: (0, 0)),
            pl.BlockSpec((1, t), lambda i, j: (0, j)),
            pl.BlockSpec((1, hb), lambda i, j: (0, (j + 1) * r)),
        ],
        out_specs=[
            pl.BlockSpec((None, cout, t), lambda i, j: (i, 0, j)),
            pl.BlockSpec((None, None, cout, 1), lambda i, j: (i, j, 0, 0)),
            pl.BlockSpec((None, None, cout, 1), lambda i, j: (i, j, 0, 0)),
        ],
        out_shape=[jax.ShapeDtypeStruct((n, cout, g2 * t), _INTERM_DTYPE), stat2, stat2],
        compiler_params=pltpu.CompilerParams(
            dimension_semantics=par,
            vmem_limit_bytes=_vmem_limit(cout, cout, t, hb)),
    )(y1, y1, scale1, bias1, w2s, m1, m1)

    scale2, bias2 = _bn_fold(s2, sq2, params["g2"], params["be2"], count, eps)

    # ---- stage 3: BN2 + ReLU + crop, one fused XLA elementwise+slice pass ----
    y2i = y2[:, :, :lp].reshape(n, cout, hpad, wpad)[:, :, 1:1 + h, 1:1 + w]
    out = jnp.maximum(scale2.reshape(1, cout, 1, 1) * y2i.astype(jnp.float32)
                      + bias2.reshape(1, cout, 1, 1), 0.0)
    return out.astype(x2_nchw.dtype)


# ------------------------------ JAX reference ------------------------------- #

def _reference_double_conv_up(x1, x2, params, eps=_EPS):
    """Plain-JAX/XLA f32 reference of the PyTorch module (training-mode BN)."""
    dy = x2.shape[2] - x1.shape[2]
    dx = x2.shape[3] - x1.shape[3]
    x1p = jnp.pad(x1, ((0, 0), (0, 0),
                       (dy // 2, dy - dy // 2), (dx // 2, dx - dx // 2)))
    x = jnp.concatenate([x2, x1p], axis=1)

    def conv_bn_relu(x, wgt, b, g, be):
        y = jax.lax.conv_general_dilated(
            x, wgt, window_strides=(1, 1), padding=((1, 1), (1, 1)),
            dimension_numbers=("NCHW", "OIHW", "NCHW"),
            precision=jax.lax.Precision.HIGHEST)
        y = y + b.reshape(1, -1, 1, 1)
        mean = jnp.mean(y, axis=(0, 2, 3), keepdims=True)
        var = jnp.mean(jnp.square(y - mean), axis=(0, 2, 3), keepdims=True)
        y = (y - mean) * jax.lax.rsqrt(var + eps)
        y = g.reshape(1, -1, 1, 1) * y + be.reshape(1, -1, 1, 1)
        return jnp.maximum(y, 0.0)

    y = conv_bn_relu(x, params["w1"], params["b1"], params["g1"], params["be1"])
    y = conv_bn_relu(y, params["w2"], params["b2"], params["g2"], params["be2"])
    return y


# --------------------------------- main -------------------------------------- #

if __name__ == "__main__":
    key = jax.random.PRNGKey(0)
    ks = jax.random.split(key, 10)

    N = 2
    C1, C2 = 4, 4          # channels of x1 and x2
    H, W = 16, 16          # x2 spatial size
    in_ch = C1 + C2        # channels after concat
    out_ch = 8

    # x1 deliberately smaller spatially to exercise the F.pad path.
    x1 = jax.random.normal(ks[0], (N, C1, 14, 15), jnp.float32)
    x2 = jax.random.normal(ks[1], (N, C2, H, W), jnp.float32)

    params = {
        # PyTorch layouts: conv weight OIHW, per-channel vectors (C,)
        "w1": 0.1 * jax.random.normal(ks[2], (out_ch, in_ch, 3, 3), jnp.float32),
        "b1": 0.1 * jax.random.normal(ks[3], (out_ch,), jnp.float32),
        "g1": 1.0 + 0.1 * jax.random.normal(ks[4], (out_ch,), jnp.float32),
        "be1": 0.1 * jax.random.normal(ks[5], (out_ch,), jnp.float32),
        "w2": 0.1 * jax.random.normal(ks[6], (out_ch, out_ch, 3, 3), jnp.float32),
        "b2": 0.1 * jax.random.normal(ks[7], (out_ch,), jnp.float32),
        "g2": 1.0 + 0.1 * jax.random.normal(ks[8], (out_ch,), jnp.float32),
        "be2": 0.1 * jax.random.normal(ks[9], (out_ch,), jnp.float32),
    }

    y = jax.jit(double_conv_up)(x1, x2, params)
    jax.block_until_ready(y)

    assert y.shape == (N, out_ch, H, W), y.shape
    assert y.dtype == jnp.float32

    # Correctness check against a plain-JAX f32 (HIGHEST-precision) reference.
    # The kernel path runs bf16 MXU operands + bf16 y1/y2 intermediates (per the
    # performance review), so the comparison tolerance reflects bf16 rounding
    # amplified by the two BatchNorm normalizations (typical max-abs ~2e-2).
    y_ref = _reference_double_conv_up(x1, x2, params)
    err_max = float(jnp.max(jnp.abs(y - y_ref)))
    err_mean = float(jnp.mean(jnp.abs(y - y_ref)))
    assert err_max < 1e-1, f"max abs err vs reference: {err_max}"
    assert err_mean < 2.5e-2, f"mean abs err vs reference: {err_mean}"

    print("KERNEL_OK")
</pallas_src>

<mosaic_0001>
module attributes {stable_mosaic.version = 11 : i64} {
  func.func @_conv1_kernel(%arg0: i32, %arg1: i32, %arg2: memref<1x8x512xbf16, #tpu.memory_space<vmem>>, %arg3: memref<1x8x128xbf16, #tpu.memory_space<vmem>>, %arg4: memref<8x72xbf16, #tpu.memory_space<vmem>>, %arg5: memref<1x512xf32, #tpu.memory_space<vmem>>, %arg6: memref<1x8x512xbf16, #tpu.memory_space<vmem>>, %arg7: memref<1x1x8x1xf32, #tpu.memory_space<vmem>>, %arg8: memref<1x1x8x1xf32, #tpu.memory_space<vmem>>) attributes {dimension_semantics = [#tpu.dimension_semantics<parallel>, #tpu.dimension_semantics<parallel>], iteration_bounds = array<i64: 2, 2>, scalar_prefetch = 0 : i64, scratch_operands = 0 : i64, tpu.core_type = #tpu.core_type<tc>, window_params = [{transform_indices = @transform_0, window_bounds = array<i64: 1, 8, 512>}, {transform_indices = @transform_1, window_bounds = array<i64: 1, 8, 128>}, {pipeline_mode = #tpu.pipeline_mode<synchronous>, transform_indices = @transform_2, window_bounds = array<i64: 8, 72>}, {transform_indices = @transform_3, window_bounds = array<i64: 1, 512>}, {transform_indices = @transform_4, window_bounds = array<i64: 1, 8, 512>}, {transform_indices = @transform_5, window_bounds = array<i64: 1, 1, 8, 1>}, {transform_indices = @transform_6, window_bounds = array<i64: 1, 1, 8, 1>}]} {
    %c0 = arith.constant 0 : index
    %c0_0 = arith.constant 0 : index
    %c0_1 = arith.constant 0 : index
    %0 = vector.load %arg2[%c0, %c0_0, %c0_1] : memref<1x8x512xbf16, #tpu.memory_space<vmem>>, vector<1x8x512xbf16>
    %1 = vector.shape_cast %0 : vector<1x8x512xbf16> to vector<8x512xbf16>
    %2 = arith.extf %1 : vector<8x512xbf16> to vector<8x512xf32>
    %c0_2 = arith.constant 0 : index
    %c0_3 = arith.constant 0 : index
    %c0_4 = arith.constant 0 : index
    %3 = vector.load %arg3[%c0_2, %c0_3, %c0_4] : memref<1x8x128xbf16, #tpu.memory_space<vmem>>, vector<1x8x128xbf16>
    %4 = vector.shape_cast %3 : vector<1x8x128xbf16> to vector<8x128xbf16>
    %5 = arith.extf %4 : vector<8x128xbf16> to vector<8x128xf32>
    %6 = tpu.concatenate %2, %5 in 1 : vector<8x512xf32>, vector<8x128xf32> -> vector<8x640xf32>
    %7 = vector.extract_strided_slice %6 {offsets = [0, 0], sizes = [8, 512], strides = [1, 1]} : vector<8x640xf32> to vector<8x512xf32>
    %8 = vector.extract_strided_slice %6 {offsets = [0, 1], sizes = [8, 512], strides = [1, 1]} : vector<8x640xf32> to vector<8x512xf32>
    %9 = vector.extract_strided_slice %6 {offsets = [0, 2], sizes = [8, 512], strides = [1, 1]} : vector<8x640xf32> to vector<8x512xf32>
    %10 = vector.extract_strided_slice %6 {offsets = [0, 18], sizes = [8, 512], strides = [1, 1]} : vector<8x640xf32> to vector<8x512xf32>
    %11 = vector.extract_strided_slice %6 {offsets = [0, 19], sizes = [8, 512], strides = [1, 1]} : vector<8x640xf32> to vector<8x512xf32>
    %12 = vector.extract_strided_slice %6 {offsets = [0, 20], sizes = [8, 512], strides = [1, 1]} : vector<8x640xf32> to vector<8x512xf32>
    %13 = vector.extract_strided_slice %6 {offsets = [0, 36], sizes = [8, 512], strides = [1, 1]} : vector<8x640xf32> to vector<8x512xf32>
    %14 = vector.extract_strided_slice %6 {offsets = [0, 37], sizes = [8, 512], strides = [1, 1]} : vector<8x640xf32> to vector<8x512xf32>
    %15 = vector.extract_strided_slice %6 {offsets = [0, 38], sizes = [8, 512], strides = [1, 1]} : vector<8x640xf32> to vector<8x512xf32>
    %16 = tpu.concatenate %7, %8, %9, %10, %11, %12, %13, %14, %15 in 0 : vector<8x512xf32>, vector<8x512xf32>, vector<8x512xf32>, vector<8x512xf32>, vector<8x512xf32>, vector<8x512xf32>, vector<8x512xf32>, vector<8x512xf32>, vector<8x512xf32> -> vector<72x512xf32>
    %17 = arith.truncf %16 : vector<72x512xf32> to vector<72x512xbf16>
    %c0_5 = arith.constant 0 : index
    %c0_6 = arith.constant 0 : index
    %18 = vector.load %arg4[%c0_5, %c0_6] : memref<8x72xbf16, #tpu.memory_space<vmem>>, vector<8x72xbf16>
    %cst = arith.constant dense<0.000000e+00> : vector<8x512xf32>
    %19 = tpu.matmul %18, %17, %cst {dimension_numbers = #tpu.dot_dimension_numbers<[1], [0], [0], [1], [0, 0, 1, 1], [], []>} : vector<8x72xbf16>, vector<72x512xbf16>, vector<8x512xf32> -> vector<8x512xf32>
    %c0_7 = arith.constant 0 : index
    %c0_8 = arith.constant 0 : index
    %20 = vector.load %arg5[%c0_7, %c0_8] : memref<1x512xf32, #tpu.memory_space<vmem>>, vector<1x512xf32>
    %cst_9 = arith.constant 5.000000e-01 : f32
    %21 = vector.broadcast %cst_9 : f32 to vector<1x512xf32>
    %22 = arith.cmpf ogt, %20, %21 : vector<1x512xf32>
    %cst_10 = arith.constant 0.000000e+00 : f32
    %23 = vector.shape_cast %22 : vector<1x512xi1> to vector<1x512xi1>
    %24 = vector.broadcast %23 : vector<1x512xi1> to vector<8x512xi1>
    %25 = vector.broadcast %cst_10 : f32 to vector<8x512xf32>
    %26 = arith.select %24, %19, %25 : vector<8x512xi1>, vector<8x512xf32>
    %cst_11 = arith.constant dense<0.000000e+00> : vector<8xf32>
    %27 = vector.multi_reduction <add>, %26, %cst_11 [1] : vector<8x512xf32> to vector<8xf32>
    %28 = vector.shape_cast %27 : vector<8xf32> to vector<8x1xf32>
    %c0_12 = arith.constant 0 : index
    %c0_13 = arith.constant 0 : index
    %c0_14 = arith.constant 0 : index
    %c0_15 = arith.constant 0 : index
    %29 = vector.load %arg7[%c0_12, %c0_13, %c0_14, %c0_15] : memref<1x1x8x1xf32, #tpu.memory_space<vmem>>, vector<1x1x8x1xf32>
    %30 = vector.shape_cast %29 : vector<1x1x8x1xf32> to vector<8x1xf32>
    %31 = vector.shape_cast %28 : vector<8x1xf32> to vector<1x1x8x1xf32>
    tpu.vector_store %arg7[%c0_12, %c0_13, %c0_14, %c0_15], %31 {strides = array<i32>} : memref<1x1x8x1xf32, #tpu.memory_space<vmem>>, vector<1x1x8x1xf32>,
    %32 = arith.mulf %26, %26 : vector<8x512xf32>
    %cst_16 = arith.constant dense<0.000000e+00> : vector<8xf32>
    %33 = vector.multi_reduction <add>, %32, %cst_16 [1] : vector<8x512xf32> to vector<8xf32>
    %34 = vector.shape_cast %33 : vector<8xf32> to vector<8x1xf32>
    %c0_17 = arith.constant 0 : index
    %c0_18 = arith.constant 0 : index
    %c0_19 = arith.constant 0 : index
    %c0_20 = arith.constant 0 : index
    %35 = vector.load %arg8[%c0_17, %c0_18, %c0_19, %c0_20] : memref<1x1x8x1xf32, #tpu.memory_space<vmem>>, vector<1x1x8x1xf32>
    %36 = vector.shape_cast %35 : vector<1x1x8x1xf32> to vector<8x1xf32>
    %37 = vector.shape_cast %34 : vector<8x1xf32> to vector<1x1x8x1xf32>
    tpu.vector_store %arg8[%c0_17, %c0_18, %c0_19, %c0_20], %37 {strides = array<i32>} : memref<1x1x8x1xf32, #tpu.memory_space<vmem>>, vector<1x1x8x1xf32>,
    %38 = arith.truncf %19 : vector<8x512xf32> to vector<8x512xbf16>
    %c0_21 = arith.constant 0 : index
    %c0_22 = arith.constant 0 : index
    %c0_23 = arith.constant 0 : index
    %39 = vector.load %arg6[%c0_21, %c0_22, %c0_23] : memref<1x8x512xbf16, #tpu.memory_space<vmem>>, vector<1x8x512xbf16>
    %40 = vector.shape_cast %39 : vector<1x8x512xbf16> to vector<8x512xbf16>
    %41 = vector.shape_cast %38 : vector<8x512xbf16> to vector<1x8x512xbf16>
    tpu.vector_store %arg6[%c0_21, %c0_22, %c0_23], %41 {strides = array<i32>} : memref<1x8x512xbf16, #tpu.memory_space<vmem>>, vector<1x8x512xbf16>,
    return
  }
  func.func @transform_0(%arg0: i32, %arg1: i32) -> (i32, i32, i32) {
    %c0_i32 = arith.constant 0 : i32
    %c0_i32_0 = arith.constant 0 : i32
    return %arg0, %c0_i32, %arg1 : i32, i32, i32
  }
  func.func @transform_1(%arg0: i32, %arg1: i32) -> (i32, i32, i32) {
    %c1_i32 = arith.constant 1 : i32
    %0 = arith.addi %arg1, %c1_i32 : i32
    %c4_i32 = arith.constant 4 : i32
    %1 = arith.muli %0, %c4_i32 : i32
    %c0_i32 = arith.constant 0 : i32
    %c0_i32_0 = arith.constant 0 : i32
    return %arg0, %c0_i32, %1 : i32, i32, i32
  }
  func.func @transform_2(%arg0: i32, %arg1: i32) -> (i32, i32) {
    %c0_i32 = arith.constant 0 : i32
    %c0_i32_0 = arith.constant 0 : i32
    %c0_i32_1 = arith.constant 0 : i32
    return %c0_i32, %c0_i32_0 : i32, i32
  }
  func.func @transform_3(%arg0: i32, %arg1: i32) -> (i32, i32) {
    %c0_i32 = arith.constant 0 : i32
    %c0_i32_0 = arith.constant 0 : i32
    return %c0_i32, %arg1 : i32, i32
  }
  func.func @transform_4(%arg0: i32, %arg1: i32) -> (i32, i32, i32) {
    %c0_i32 = arith.constant 0 : i32
    %c0_i32_0 = arith.constant 0 : i32
    return %arg0, %c0_i32, %arg1 : i32, i32, i32
  }
  func.func @transform_5(%arg0: i32, %arg1: i32) -> (i32, i32, i32, i32) {
    %c0_i32 = arith.constant 0 : i32
    %c0_i32_0 = arith.constant 0 : i32
    %c0_i32_1 = arith.constant 0 : i32
    return %arg0, %arg1, %c0_i32, %c0_i32_0 : i32, i32, i32, i32
  }
  func.func @transform_6(%arg0: i32, %arg1: i32) -> (i32, i32, i32, i32) {
    %c0_i32 = arith.constant 0 : i32
    %c0_i32_0 = arith.constant 0 : i32
    %c0_i32_1 = arith.constant 0 : i32
    return %arg0, %arg1, %c0_i32, %c0_i32_0 : i32, i32, i32, i32
  }
}

module attributes {stable_mosaic.version = 11 : i64} {
  func.func @_bn_relu_conv_kernel(%arg0: i32, %arg1: i32, %arg2: memref<1x8x512xbf16, #tpu.memory_space<vmem>>, %arg3: memref<1x8x128xbf16, #tpu.memory_space<vmem>>, %arg4: memref<8x1xf32, #tpu.memory_space<vmem>>, %arg5: memref<8x1xf32, #tpu.memory_space<vmem>>, %arg6: memref<8x72xbf16, #tpu.memory_space<vmem>>, %arg7: memref<1x512xf32, #tpu.memory_space<vmem>>, %arg8: memref<1x128xf32, #tpu.memory_space<vmem>>, %arg9: memref<1x8x512xbf16, #tpu.memory_space<vmem>>, %arg10: memref<1x1x8x1xf32, #tpu.memory_space<vmem>>, %arg11: memref<1x1x8x1xf32, #tpu.memory_space<vmem>>) attributes {dimension_semantics = [#tpu.dimension_semantics<parallel>, #tpu.dimension_semantics<parallel>], iteration_bounds = array<i64: 2, 1>, scalar_prefetch = 0 : i64, scratch_operands = 0 : i64, tpu.core_type = #tpu.core_type<tc>, window_params = [{transform_indices = @transform_0, window_bounds = array<i64: 1, 8, 512>}, {transform_indices = @transform_1, window_bounds = array<i64: 1, 8, 128>}, {pipeline_mode = #tpu.pipeline_mode<synchronous>, transform_indices = @transform_2, window_bounds = array<i64: 8, 1>}, {pipeline_mode = #tpu.pipeline_mode<synchronous>, transform_indices = @transform_3, window_bounds = array<i64: 8, 1>}, {pipeline_mode = #tpu.pipeline_mode<synchronous>, transform_indices = @transform_4, window_bounds = array<i64: 8, 72>}, {transform_indices = @transform_5, window_bounds = array<i64: 1, 512>}, {transform_indices = @transform_6, window_bounds = array<i64: 1, 128>}, {transform_indices = @transform_7, window_bounds = array<i64: 1, 8, 512>}, {transform_indices = @transform_8, window_bounds = array<i64: 1, 1, 8, 1>}, {transform_indices = @transform_9, window_bounds = array<i64: 1, 1, 8, 1>}]} {
    %c0 = arith.constant 0 : index
    %c0_0 = arith.constant 0 : index
    %c0_1 = arith.constant 0 : index
    %0 = vector.load %arg2[%c0, %c0_0, %c0_1] : memref<1x8x512xbf16, #tpu.memory_space<vmem>>, vector<1x8x512xbf16>
    %1 = vector.shape_cast %0 : vector<1x8x512xbf16> to vector<8x512xbf16>
    %2 = arith.extf %1 : vector<8x512xbf16> to vector<8x512xf32>
    %c0_2 = arith.constant 0 : index
    %c0_3 = arith.constant 0 : index
    %c0_4 = arith.constant 0 : index
    %3 = vector.load %arg3[%c0_2, %c0_3, %c0_4] : memref<1x8x128xbf16, #tpu.memory_space<vmem>>, vector<1x8x128xbf16>
    %4 = vector.shape_cast %3 : vector<1x8x128xbf16> to vector<8x128xbf16>
    %5 = arith.extf %4 : vector<8x128xbf16> to vector<8x128xf32>
    %6 = tpu.concatenate %2, %5 in 1 : vector<8x512xf32>, vector<8x128xf32> -> vector<8x640xf32>
    %c0_5 = arith.constant 0 : index
    %c0_6 = arith.constant 0 : index
    %7 = vector.load %arg7[%c0_5, %c0_6] : memref<1x512xf32, #tpu.memory_space<vmem>>, vector<1x512xf32>
    %c0_7 = arith.constant 0 : index
    %c0_8 = arith.constant 0 : index
    %8 = vector.load %arg8[%c0_7, %c0_8] : memref<1x128xf32, #tpu.memory_space<vmem>>, vector<1x128xf32>
    %9 = tpu.concatenate %7, %8 in 1 : vector<1x512xf32>, vector<1x128xf32> -> vector<1x640xf32>
    %c0_9 = arith.constant 0 : index
    %c0_10 = arith.constant 0 : index
    %10 = vector.load %arg4[%c0_9, %c0_10] : memref<8x1xf32, #tpu.memory_space<vmem>>, vector<8x1xf32>
    %11 = vector.broadcast %10 : vector<8x1xf32> to vector<8x640xf32>
    %12 = arith.mulf %11, %6 : vector<8x640xf32>
    %c0_11 = arith.constant 0 : index
    %c0_12 = arith.constant 0 : index
    %13 = vector.load %arg5[%c0_11, %c0_12] : memref<8x1xf32, #tpu.memory_space<vmem>>, vector<8x1xf32>
    %14 = vector.broadcast %13 : vector<8x1xf32> to vector<8x640xf32>
    %15 = arith.addf %12, %14 : vector<8x640xf32>
    %cst = arith.constant 5.000000e-01 : f32
    %16 = vector.broadcast %cst : f32 to vector<1x640xf32>
    %17 = arith.cmpf ogt, %9, %16 : vector<1x640xf32>
    %cst_13 = arith.constant 0.000000e+00 : f32
    %18 = vector.broadcast %cst_13 : f32 to vector<8x640xf32>
    %19 = arith.maximumf %15, %18 : vector<8x640xf32>
    %cst_14 = arith.constant 0.000000e+00 : f32
    %20 = vector.shape_cast %17 : vector<1x640xi1> to vector<1x640xi1>
    %21 = vector.broadcast %20 : vector<1x640xi1> to vector<8x640xi1>
    %22 = vector.broadcast %cst_14 : f32 to vector<8x640xf32>
    %23 = arith.select %21, %19, %22 : vector<8x640xi1>, vector<8x640xf32>
    %24 = vector.extract_strided_slice %23 {offsets = [0, 0], sizes = [8, 512], strides = [1, 1]} : vector<8x640xf32> to vector<8x512xf32>
    %25 = vector.extract_strided_slice %23 {offsets = [0, 1], sizes = [8, 512], strides = [1, 1]} : vector<8x640xf32> to vector<8x512xf32>
    %26 = vector.extract_strided_slice %23 {offsets = [0, 2], sizes = [8, 512], strides = [1, 1]} : vector<8x640xf32> to vector<8x512xf32>
    %27 = vector.extract_strided_slice %23 {offsets = [0, 18], sizes = [8, 512], strides = [1, 1]} : vector<8x640xf32> to vector<8x512xf32>
    %28 = vector.extract_strided_slice %23 {offsets = [0, 19], sizes = [8, 512], strides = [1, 1]} : vector<8x640xf32> to vector<8x512xf32>
    %29 = vector.extract_strided_slice %23 {offsets = [0, 20], sizes = [8, 512], strides = [1, 1]} : vector<8x640xf32> to vector<8x512xf32>
    %30 = vector.extract_strided_slice %23 {offsets = [0, 36], sizes = [8, 512], strides = [1, 1]} : vector<8x640xf32> to vector<8x512xf32>
    %31 = vector.extract_strided_slice %23 {offsets = [0, 37], sizes = [8, 512], strides = [1, 1]} : vector<8x640xf32> to vector<8x512xf32>
    %32 = vector.extract_strided_slice %23 {offsets = [0, 38], sizes = [8, 512], strides = [1, 1]} : vector<8x640xf32> to vector<8x512xf32>
    %33 = tpu.concatenate %24, %25, %26, %27, %28, %29, %30, %31, %32 in 0 : vector<8x512xf32>, vector<8x512xf32>, vector<8x512xf32>, vector<8x512xf32>, vector<8x512xf32>, vector<8x512xf32>, vector<8x512xf32>, vector<8x512xf32>, vector<8x512xf32> -> vector<72x512xf32>
    %34 = arith.truncf %33 : vector<72x512xf32> to vector<72x512xbf16>
    %c0_15 = arith.constant 0 : index
    %c0_16 = arith.constant 0 : index
    %35 = vector.load %arg6[%c0_15, %c0_16] : memref<8x72xbf16, #tpu.memory_space<vmem>>, vector<8x72xbf16>
    %cst_17 = arith.constant dense<0.000000e+00> : vector<8x512xf32>
    %36 = tpu.matmul %35, %34, %cst_17 {dimension_numbers = #tpu.dot_dimension_numbers<[1], [0], [0], [1], [0, 0, 1, 1], [], []>} : vector<8x72xbf16>, vector<72x512xbf16>, vector<8x512xf32> -> vector<8x512xf32>
    %37 = vector.extract_strided_slice %9 {offsets = [0, 19], sizes = [1, 512], strides = [1, 1]} : vector<1x640xf32> to vector<1x512xf32>
    %cst_18 = arith.constant 5.000000e-01 : f32
    %38 = vector.broadcast %cst_18 : f32 to vector<1x512xf32>
    %39 = arith.cmpf ogt, %37, %38 : vector<1x512xf32>
    %cst_19 = arith.constant 0.000000e+00 : f32
    %40 = vector.shape_cast %39 : vector<1x512xi1> to vector<1x512xi1>
    %41 = vector.broadcast %40 : vector<1x512xi1> to vector<8x512xi1>
    %42 = vector.broadcast %cst_19 : f32 to vector<8x512xf32>
    %43 = arith.select %41, %36, %42 : vector<8x512xi1>, vector<8x512xf32>
    %cst_20 = arith.constant dense<0.000000e+00> : vector<8xf32>
    %44 = vector.multi_reduction <add>, %43, %cst_20 [1] : vector<8x512xf32> to vector<8xf32>
    %45 = vector.shape_cast %44 : vector<8xf32> to vector<8x1xf32>
    %c0_21 = arith.constant 0 : index
    %c0_22 = arith.constant 0 : index
    %c0_23 = arith.constant 0 : index
    %c0_24 = arith.constant 0 : index
    %46 = vector.load %arg10[%c0_21, %c0_22, %c0_23, %c0_24] : memref<1x1x8x1xf32, #tpu.memory_space<vmem>>, vector<1x1x8x1xf32>
    %47 = vector.shape_cast %46 : vector<1x1x8x1xf32> to vector<8x1xf32>
    %48 = vector.shape_cast %45 : vector<8x1xf32> to vector<1x1x8x1xf32>
    tpu.vector_store %arg10[%c0_21, %c0_22, %c0_23, %c0_24], %48 {strides = array<i32>} : memref<1x1x8x1xf32, #tpu.memory_space<vmem>>, vector<1x1x8x1xf32>,
    %49 = arith.mulf %43, %43 : vector<8x512xf32>
    %cst_25 = arith.constant dense<0.000000e+00> : vector<8xf32>
    %50 = vector.multi_reduction <add>, %49, %cst_25 [1] : vector<8x512xf32> to vector<8xf32>
    %51 = vector.shape_cast %50 : vector<8xf32> to vector<8x1xf32>
    %c0_26 = arith.constant 0 : index
    %c0_27 = arith.constant 0 : index
    %c0_28 = arith.constant 0 : index
    %c0_29 = arith.constant 0 : index
    %52 = vector.load %arg11[%c0_26, %c0_27, %c0_28, %c0_29] : memref<1x1x8x1xf32, #tpu.memory_space<vmem>>, vector<1x1x8x1xf32>
    %53 = vector.shape_cast %52 : vector<1x1x8x1xf32> to vector<8x1xf32>
    %54 = vector.shape_cast %51 : vector<8x1xf32> to vector<1x1x8x1xf32>
    tpu.vector_store %arg11[%c0_26, %c0_27, %c0_28, %c0_29], %54 {strides = array<i32>} : memref<1x1x8x1xf32, #tpu.memory_space<vmem>>, vector<1x1x8x1xf32>,
    %55 = arith.truncf %36 : vector<8x512xf32> to vector<8x512xbf16>
    %c0_30 = arith.constant 0 : index
    %c0_31 = arith.constant 0 : index
    %c0_32 = arith.constant 0 : index
    %56 = vector.load %arg9[%c0_30, %c0_31, %c0_32] : memref<1x8x512xbf16, #tpu.memory_space<vmem>>, vector<1x8x512xbf16>
    %57 = vector.shape_cast %56 : vector<1x8x512xbf16> to vector<8x512xbf16>
    %58 = vector.shape_cast %55 : vector<8x512xbf16> to vector<1x8x512xbf16>
    tpu.vector_store %arg9[%c0_30, %c0_31, %c0_32], %58 {strides = array<i32>} : memref<1x8x512xbf16, #tpu.memory_space<vmem>>, vector<1x8x512xbf16>,
    return
  }
  func.func @transform_0(%arg0: i32, %arg1: i32) -> (i32, i32, i32) {
    %c0_i32 = arith.constant 0 : i32
    %c0_i32_0 = arith.constant 0 : i32
    return %arg0, %c0_i32, %arg1 : i32, i32, i32
  }
  func.func @transform_1(%arg0: i32, %arg1: i32) -> (i32, i32, i32) {
    %c1_i32 = arith.constant 1 : i32
    %0 = arith.addi %arg1, %c1_i32 : i32
    %c4_i32 = arith.constant 4 : i32
    %1 = arith.muli %0, %c4_i32 : i32
    %c0_i32 = arith.constant 0 : i32
    %c0_i32_0 = arith.constant 0 : i32
    return %arg0, %c0_i32, %1 : i32, i32, i32
  }
  func.func @transform_2(%arg0: i32, %arg1: i32) -> (i32, i32) {
    %c0_i32 = arith.constant 0 : i32
    %c0_i32_0 = arith.constant 0 : i32
    %c0_i32_1 = arith.constant 0 : i32
    return %c0_i32, %c0_i32_0 : i32, i32
  }
  func.func @transform_3(%arg0: i32, %arg1: i32) -> (i32, i32) {
    %c0_i32 = arith.constant 0 : i32
    %c0_i32_0 = arith.constant 0 : i32
    %c0_i32_1 = arith.constant 0 : i32
    return %c0_i32, %c0_i32_0 : i32, i32
  }
  func.func @transform_4(%arg0: i32, %arg1: i32) -> (i32, i32) {
    %c0_i32 = arith.constant 0 : i32
    %c0_i32_0 = arith.constant 0 : i32
    %c0_i32_1 = arith.constant 0 : i32
    return %c0_i32, %c0_i32_0 : i32, i32
  }
  func.func @transform_5(%arg0: i32, %arg1: i32) -> (i32, i32) {
    %c0_i32 = arith.constant 0 : i32
    %c0_i32_0 = arith.constant 0 : i32
    return %c0_i32, %arg1 : i32, i32
  }
  func.func @transform_6(%arg0: i32, %arg1: i32) -> (i32, i32) {
    %c1_i32 = arith.constant 1 : i32
    %0 = arith.addi %arg1, %c1_i32 : i32
    %c4_i32 = arith.constant 4 : i32
    %1 = arith.muli %0, %c4_i32 : i32
    %c0_i32 = arith.constant 0 : i32
    %c0_i32_0 = arith.constant 0 : i32
    return %c0_i32, %1 : i32, i32
  }
  func.func @transform_7(%arg0: i32, %arg1: i32) -> (i32, i32, i32) {
    %c0_i32 = arith.constant 0 : i32
    %c0_i32_0 = arith.constant 0 : i32
    return %arg0, %c0_i32, %arg1 : i32, i32, i32
  }
  func.func @transform_8(%arg0: i32, %arg1: i32) -> (i32, i32, i32, i32) {
    %c0_i32 = arith.constant 0 : i32
    %c0_i32_0 = arith.constant 0 : i32
    %c0_i32_1 = arith.constant 0 : i32
    return %arg0, %arg1, %c0_i32, %c0_i32_0 : i32, i32, i32, i32
  }
  func.func @transform_9(%arg0: i32, %arg1: i32) -> (i32, i32, i32, i32) {
    %c0_i32 = arith.constant 0 : i32
    %c0_i32_0 = arith.constant 0 : i32
    %c0_i32_1 = arith.constant 0 : i32
    return %arg0, %arg1, %c0_i32, %c0_i32_0 : i32, i32, i32, i32
  }
}

</mosaic_0001>

<bundles_post_ra>
// kernel: double_conv_up.2
= control target key start
LH: loop header
LB: loop body
LE: loop exit
PB: predicated region body
PF: predicated region fallthrough
CT: control target
= control target key end

     0   :  { %s1224_s21 = smov 0   ;;  %s1226_s22 = smov 0   ;;  %s1381_s0 = inlined_call_operand.vmem [shape: bf16[2,8,1152], index: 0, kind: input, shape index: {}, may-alias: {0,1}]   ;;  %s1382_s1 = inlined_call_operand.vmem [shape: bf16[2,8,1152], index: 1, kind: input, shape index: {}, may-alias: {0,1}]   ;;  %s1383_s2 = inlined_call_operand.vmem [shape: bf16[8,72], index: 2, kind: input, shape index: {}]   ;;  %s1384_s3 = inlined_call_operand.vmem [shape: f32[1,1024], index: 3, kind: input, shape index: {}]   ;;  %s1385_s4 = inlined_call_operand.vmem [shape: bf16[2,8,1024], index: 4, kind: output, shape index: {0}]   ;;  %s1386_s5 = inlined_call_operand.vmem [shape: f32[2,2,8,1], index: 5, kind: output, shape index: {1}]   ;;  %s1387_s6 = inlined_call_operand.vmem [shape: f32[2,2,8,1], index: 6, kind: output, shape index: {2}]  }
   0x1   :  { %s1228_s23 = smov 0   ;;  %s1230_s24 = smov 0  }
   0x2   :  { %s1232_s25 = smov 0  }
   0x3 LB: > { %s26_s26 = sadd.s32 1, %s1170_s23  ;;  %s29_s27 = sadd.s32 1, %s1174_s24  ;;  %s1178_s25 = sphi %s1232_s25, %s17_s25   ;;  %s1174_s24 = sphi %s1230_s24, %s1391_s24   ;;  %s1170_s23 = sphi %s1228_s23, %s1390_s23   ;;  %s1166_s22 = sphi %s1226_s22, %s1389_s22   ;;  %s1162_s21 = sphi %s1224_s21, %s1388_s21  }
   0x4   : > { %p27_p0 = scmp.ge.s32.totalorder %s26_s26, 2  ;;  %p981_p1 = scmp.ge.s32.totalorder %s1178_s25, 1 }
   0x5   : > { %p283_p2 = scmp.lt.s32.totalorder %s1178_s25, 5 }
   0x6   : > { %s1393_s26 = smov (%p27_p0, %s26_s26), 0  ;;  %s1395_s27 = smov (!%p27_p0, %s29_s27), %s1174_s24 }
   0x7   : > { %p284_p3 = pnand %p981_p1, %p283_p2  ;;  %p31_p4 = scmp.ge.s32.totalorder %s1395_s27, 2 }
   0x8   : > { %s1257_s28 = sshll.u32 (!%p284_p3), %s1162_s21, 2  ;;  %p360_p5 = scmp.lt.s32.totalorder (!%p284_p3), %s1166_s22, 1 }
   0x9   : > { %s1397_s27 = smov (%p31_p4, %s1395_s27), 0  ;;  %287 = sbr.rel (%p284_p3) target bundleno = 536 (0x218), region = 36 }
   0xa   : > { %p362_p6 = scmp.lt.s32.totalorder (!%p284_p3), %s1257_s28, 8  ;;  %s1007_s7 = sadd.s32 (!%p284_p3), 4, %s1257_s28 }
   0xb   : > { %p377_p7 = scmp.lt.s32.totalorder (!%p284_p3), %s1007_s7, 8  ;;  %s1180_s18 = smov (!%p284_p3), 92  }
   0xc   : > { %s1181_s19 = smov (!%p284_p3), 90   ;;  %s1182_s20 = smov (!%p284_p3), 91  }
   0xd   : > { %p386_p8 = scmp.lt.s32.totalorder (!%p284_p3), %s1257_s28, 7  ;;  %p402_p9 = scmp.lt.s32.totalorder (!%p284_p3), %s1162_s21, 1 }
   0xe   : > { %s1399_s22 = smov (!%p360_p5, %s1166_s22), 1  ;;  %s1401_s7 = smov (!%p377_p7, %s1007_s7), 8  ;;  %v1188_v12 = vmov 0   ;;  %vm573_vm1 = vcmask 736256   ;;  %vm535_vm2 = vcmask 752640   ;;  %vm554_vm3 = vcmask 744448  }
   0xf   : > { %s363_s29 = scalar_select %p362_p6, %s1257_s28, 8  ;;  %652 = vmatprep.mubr.bf16.mxu0 %v1188_v12  ;;  %693 = vmatprep.mubr.bf16.mxu1 %v1188_v12  ;;  %vm607_vm4 = vcmask 1043456   ;;  %vm497_vm5 = vcmask 891904   ;;  %vm516_vm6 = vcmask 883712   ;;  %vm459_vm7 = vcmask 1031168  }
  0x10   : > { %s1010_s30 = smul.u32 9, %s1399_s22  ;;  %s1403_s28 = smov (!%p386_p8, %s1257_s28), 7  ;;  %vm478_vm8 = vcmask 900096   ;;  %vm440_vm9 = vcmask 1039360   ;;  %vm603_vm10 = vcmask 588800   ;;  %vm734_vm15 = vcmask 7168  }
  0x11   : > { %s988_s15 = sshll.u32 %s1399_s22, 3  ;;  %s1405_s21 = smov (!%p402_p9, %s1162_s21), 1 }
  0x12   : > { %s365_s8 = sadd.s32 %s1010_s30, %s363_s29  ;;  %s380_s13 = sadd.s32 %s1010_s30, %s1401_s7 }
  0x13   : > { %s983_s9 = sshll.u32 %s365_s8, 2  ;;  %s985_s14 = sshll.u32 %s380_s13, 2 }
  0x14   : > { %s367_s12 = scalar_lea.vmem %s1381_s0, %s983_s9  ;;  %s382_s17 = scalar_lea.vmem %s1382_s1, %s985_s14 }
  0x15   : > { %v417_v0 = vld [vmem:[%s367_s12] sm:$0xff]  ;;  %v418_v1 = vld [vmem:[%s367_s12 + $0x8] sm:$0xff]  ;;  %s1183_s29 = smov 109   ;;  %s1184_s30 = smov 108  }
  0x16   : > { %v1268_v2 = vunpack.c.h.bf16 %v417_v0  ;;  %v1270_v3 = vunpack.c.l.bf16 %v418_v1  ;;  %v1272_v4 = vunpack.c.h.bf16 %v418_v1  ;;  %v1274_v5 = vunpack.c.l.bf16 %v417_v0  ;;  %v423_v9 = vld [vmem:[%s382_s17] sm:$0xf]  ;;  %s1185_s7 = smov 126   ;;  %s1186_s8 = smov 110  }
  0x17   : > { %v424_v11 = vunpack.c.l.bf16 %v423_v9  ;;  %s1187_s9 = smov 127   ;;  %s388_s12 = scalar_lea.vmem %s1384_s3, %s1403_s28 }
  0x18   : > { %v1070_v6 = vpack.i.bf16 %v1270_v3, %v1268_v2  ;;  %v1060_v7 = vpack.i.bf16 %v1268_v2, %v1274_v5  ;;  %v1065_v8 = vpack.i.bf16 %v1272_v4, %v1270_v3  ;;  %v1080_v10 = vpack.i.bf16 %v1272_v4, %v1274_v5  ;;  %v702_v13 = vld [vmem:[%s388_s12] sm:$0xf]  ;;  %s396_s16 = sadd.s32 %s988_s15, %s1403_s28  ;;  %s990_s28 = sshll.u32 %s1399_s22, 1 }
  0x19   : > { %vm703_vm0 = vcmp.gt.f32.partialorder %v702_v13, 0.5  ;;  %s989_s17 = sshll.u32 %s396_s16, 2 }
  0x1a   : > { %1071 = vrot.lane.b32.xlu1 %v1070_v6, %s1180_s18  ;;  %1061 = vrot.lane.b32.xlu0 %v1060_v7, %s1181_s19  ;;  %v1295_v14 = vsel %vm703_vm0, 1, %v1188_v12 }
  0x1e   : > { %1076 = vrot.lane.b32.xlu1 %v1070_v6, %s1182_s20  ;;  %1066 = vrot.lane.b32.xlu0 %v1065_v8, %s1181_s19 }
  0x22   : > { %1081 = vrot.lane.b32.xlu1 %v1080_v10, %s1180_s18  ;;  %571 = vrot.lane.b32.xlu0 %v424_v11, %s1181_s19 }
  0x26   : > { %1091 = vrot.lane.b32.xlu1 %v1070_v6, %s1183_s29  ;;  %1086 = vrot.lane.b32.xlu0 %v1080_v10, %s1182_s20 }
  0x2a   : > { %533 = vrot.lane.b32.xlu1 %v424_v11, %s1180_s18  ;;  %1096 = vrot.lane.b32.xlu0 %v1070_v6, %s1184_s30 }
  0x2e   : > { %1101 = vrot.lane.b32.xlu1 %v1080_v10, %s1183_s29  ;;  %552 = vrot.lane.b32.xlu0 %v424_v11, %s1182_s20  ;;  %s398_s20 = scalar_lea.vmem %s1385_s4, %s989_s17 }
  0x32   : > { %1111 = vrot.lane.b32.xlu1 %v1070_v6, %s1185_s7  ;;  %1106 = vrot.lane.b32.xlu0 %v1080_v10, %s1184_s30 }
  0x36   : > { %495 = vrot.lane.b32.xlu1 %v424_v11, %s1183_s29  ;;  %1116 = vrot.lane.b32.xlu0 %v1070_v6, %s1186_s8  ;;  %s405_s29 = sadd.s32 %s990_s28, %s1405_s21 }
  0x3a   : > { %1121 = vrot.lane.b32.xlu1 %v1080_v10, %s1185_s7  ;;  %514 = vrot.lane.b32.xlu0 %v424_v11, %s1184_s30  ;;  %s991_s30 = sshll.u32 %s405_s29, 3 }
  0x3b   : > { %s415_s12 = scalar_lea.vmem %s1387_s6, %s991_s30 }
  0x3e   : > { %1131 = vrot.lane.b32.xlu1 %v1070_v6, %s1187_s9  ;;  %1126 = vrot.lane.b32.xlu0 %v1080_v10, %s1186_s8 }
  0x42   : > { %476 = vrot.lane.b32.xlu1 %v424_v11, %s1186_s8  ;;  %457 = vrot.lane.b32.xlu0 %v424_v11, %s1185_s7 }
  0x46   : > { %1136 = vrot.lane.b32.xlu0 %v1080_v10, %s1187_s9  ;;  %438 = vrot.lane.b32.xlu1 %v424_v11, %s1187_s9  ;;  %s407_s9 = scalar_lea.vmem %s1386_s5, %s991_s30 }
  0x8c   : > { %v1297_v15 = vpop.permute.xlu1 %1071  ;;  %v1062_v16 = vpop.permute.xlu0 %1061 }
  0x8d   : > { %v1074_v17 = vunpack.i.h.bf16 %v1297_v15  ;;  %v1073_v18 = vunpack.i.l.bf16 %v1297_v15  ;;  %v1064_v19 = vunpack.i.h.bf16 %v1062_v16  ;;  %v1063_v20 = vunpack.i.l.bf16 %v1062_v16 }
  0x8f   : > { %v574_v21 = vsel %vm573_vm1, %v1063_v20, %v1064_v19  ;;  %v537_v24 = vsel %vm535_vm2, %v1073_v18, %v1074_v17 }
  0x90   : > { %v1077_v22 = vpop.permute.xlu1 %1076  ;;  %v1067_v23 = vpop.permute.xlu0 %1066  ;;  %v598_v29 = vpack.c.bf16 %v574_v21, %v574_v21 }
  0x91   : > { %v1079_v25 = vunpack.i.h.bf16 %v1077_v22  ;;  %v1078_v26 = vunpack.i.l.bf16 %v1077_v22  ;;  %v1069_v27 = vunpack.i.h.bf16 %v1067_v23  ;;  %v1068_v28 = vunpack.i.l.bf16 %v1067_v23 }
  0x92   : > { %v609_v39 = vsel %vm607_vm4, %v598_v29, 0 }
  0x93   : > { %v575_v30 = vsel %vm573_vm1, %v1064_v19, %v1068_v28  ;;  %v556_v31 = vsel %vm554_vm3, %v1078_v26, %v1079_v25  ;;  %v576_v32 = vsel %vm573_vm1, %v1068_v28, %v1069_v27 }
  0x94   : > { %v1082_v33 = vpop.permute.xlu1 %1081  ;;  %v572_v34 = vpop.permute.xlu0 %571  ;;  %v599_v35 = vpack.c.bf16 %v575_v30, %v575_v30  ;;  %v595_v36 = vpack.c.bf16 %v556_v31, %v537_v24  ;;  %v600_v37 = vpack.c.bf16 %v576_v32, %v576_v32 }
  0x95   : > { %v577_v38 = vsel %vm573_vm1, %v1069_v27, %v572_v34  ;;  %v1083_v41 = vunpack.i.l.bf16 %v1082_v33  ;;  %v1084_v57 = vunpack.i.h.bf16 %v1082_v33 }
  0x96   : > { %994 = vmatprep.subr.msk.bf16.mxu0 %vm607_vm4, %v599_v35  ;;  %v601_v40 = vpack.c.bf16 %v577_v38, %v577_v38  ;;  %v615_v44 = vsel %vm607_vm4, %v600_v37, 0 }
  0x97   : > { %627 = vmatpush1.bf16.msra.mxu0 %v609_v39  ;;  %v536_v48 = vsel %vm535_vm2, %v1083_v41, %v1073_v18  ;;  %v538_v6 = vsel %vm535_vm2, %v1074_v17, %v1084_v57 }
  0x98   : > { %v1309_v42 = vpop.permute.xlu1 %1091  ;;  %v1087_v43 = vpop.permute.xlu0 %1086  ;;  %628 = vmatprep.subr.bf16.mxu0 %v595_v36  ;;  %996 = vmatprep.subr.msk.bf16.mxu1 %vm607_vm4, %v601_v40 }
  0x99   : > { %v1094_v45 = vunpack.i.h.bf16 %v1309_v42  ;;  %v1093_v46 = vunpack.i.l.bf16 %v1309_v42  ;;  %v1088_v47 = vunpack.i.l.bf16 %v1087_v43  ;;  %668 = vmatpush1.bf16.msra.mxu1 %v615_v44  ;;  %v1089_v50 = vunpack.i.h.bf16 %v1087_v43 }
  0x9b   : > { %v555_v49 = vsel %vm554_vm3, %v1088_v47, %v1078_v26  ;;  %v499_v56 = vsel %vm497_vm5, %v1093_v46, %v1094_v45  ;;  %v557_v62 = vsel %vm554_vm3, %v1079_v25, %v1089_v50 }
  0x9c   : > { %v534_v51 = vpop.permute.xlu1 %533  ;;  %v1097_v52 = vpop.permute.xlu0 %1096  ;;  %v594_v53 = vpack.c.bf16 %v555_v49, %v536_v48  ;;  %v596_v8 = vpack.c.bf16 %v557_v62, %v538_v6  ;;  %v705_v6 = vlaneseq }
  0x9d   : > { %v1099_v54 = vunpack.i.h.bf16 %v1097_v52  ;;  %v1098_v55 = vunpack.i.l.bf16 %v1097_v52  ;;  %v539_v63 = vsel %vm535_vm2, %v1084_v57, %v534_v51 }
  0x9e   : > { %629 = vmatpush1.bf16.msra.mxu0 %v594_v53 }
  0x9f   : > { %v518_v58 = vsel %vm516_vm6, %v1098_v55, %v1099_v54 }
  0xa0   : > { %v1102_v59 = vpop.permute.xlu1 %1101  ;;  %v553_v60 = vpop.permute.xlu0 %552  ;;  %v591_v61 = vpack.c.bf16 %v518_v58, %v499_v56 }
  0xa1   : > { %v558_v0 = vsel %vm554_vm3, %v1089_v50, %v553_v60  ;;  %v1103_v7 = vunpack.i.l.bf16 %v1102_v59  ;;  %v1104_v24 = vunpack.i.h.bf16 %v1102_v59 }
  0xa2   : > { %v597_v1 = vpack.c.bf16 %v558_v0, %v539_v63  ;;  %630 = vmatprep.subr.bf16.mxu0 %v591_v61 }
  0xa3   : > { %v498_v15 = vsel %vm497_vm5, %v1103_v7, %v1093_v46  ;;  %v500_v33 = vsel %vm497_vm5, %v1094_v45, %v1104_v24  ;;  %v706_v7 = vshrl.u32 %v705_v6, 7 }
  0xa4   : > { %v1112_v9 = vpop.permute.xlu1 %1111  ;;  %v1107_v10 = vpop.permute.xlu0 %1106  ;;  %669 = vmatprep.subr.bf16.mxu1 %v597_v1  ;;  %v602_v1 = vld [vmem:[%s1383_s2] sm:$0xf] }
  0xa5   : > { %v1114_v11 = vunpack.i.h.bf16 %v1112_v9  ;;  %v1113_v12 = vunpack.i.l.bf16 %v1112_v9  ;;  %v1108_v13 = vunpack.i.l.bf16 %v1107_v10  ;;  %670 = vmatpush1.bf16.msra.mxu1 %v596_v8  ;;  %v1109_v18 = vunpack.i.h.bf16 %v1107_v10 }
  0xa6   : > { %v707_v8 = vsub.s32 0, %v706_v7  ;;  %v715_v9 = vsub.s32 2, %v706_v7 }
  0xa7   : > { %v517_v16 = vsel %vm516_vm6, %v1108_v13, %v1098_v55  ;;  %v461_v23 = vsel %vm459_vm7, %v1113_v12, %v1114_v11  ;;  %v519_v29 = vsel %vm516_vm6, %v1099_v54, %v1109_v18 }
  0xa8   : > { %v496_v19 = vpop.permute.xlu1 %495  ;;  %v1117_v20 = vpop.permute.xlu0 %1116  ;;  %v590_v21 = vpack.c.bf16 %v517_v16, %v498_v15  ;;  %v592_v35 = vpack.c.bf16 %v519_v29, %v500_v33  ;;  %v716_v10 = vrot.slane %v1295_v14, %v715_v9 }
  0xa9   : > { %v1119_v17 = vunpack.i.h.bf16 %v1117_v20  ;;  %v1118_v22 = vunpack.i.l.bf16 %v1117_v20  ;;  %v501_v30 = vsel %vm497_vm5, %v1104_v24, %v496_v19 }
  0xaa   : > { %631 = vmatpush1.bf16.msra.mxu0 %v590_v21  ;;  %vm723_vm12 = vcmp.eq.s32.totalorder %v716_v10, 1 }
  0xab   : > { %v480_v25 = vsel %vm478_vm8, %v1118_v22, %v1119_v17 }
  0xac   : > { %v1122_v26 = vpop.permute.xlu1 %1121  ;;  %v515_v27 = vpop.permute.xlu0 %514  ;;  %v587_v28 = vpack.c.bf16 %v480_v25, %v461_v23 }
  0xad   : > { %v520_v31 = vsel %vm516_vm6, %v1109_v18, %v515_v27  ;;  %v1123_v34 = vunpack.i.l.bf16 %v1122_v26  ;;  %v1124_v42 = vunpack.i.h.bf16 %v1122_v26 }
  0xae   : > { %v593_v32 = vpack.c.bf16 %v520_v31, %v501_v30  ;;  %632 = vmatprep.subr.bf16.mxu0 %v587_v28 }
  0xaf   : > { %v460_v43 = vsel %vm459_vm7, %v1123_v34, %v1113_v12  ;;  %v462_v54 = vsel %vm459_vm7, %v1114_v11, %v1124_v42 }
  0xb0   : > { %v1132_v36 = vpop.permute.xlu1 %1131  ;;  %v1127_v37 = vpop.permute.xlu0 %1126  ;;  %671 = vmatprep.subr.bf16.mxu1 %v593_v32 }
  0xb1   : > { %v1134_v38 = vunpack.i.h.bf16 %v1132_v36  ;;  %v1133_v39 = vunpack.i.l.bf16 %v1132_v36  ;;  %v1129_v40 = vunpack.i.h.bf16 %v1127_v37  ;;  %v1128_v41 = vunpack.i.l.bf16 %v1127_v37  ;;  %672 = vmatpush1.bf16.msra.mxu1 %v592_v35 }
  0xb3   : > { %v479_v44 = vsel %vm478_vm8, %v1128_v41, %v1118_v22  ;;  %v442_v46 = vsel %vm440_vm9, %v1133_v39, %v1134_v38  ;;  %v481_v49 = vsel %vm478_vm8, %v1119_v17, %v1129_v40 }
  0xb4   : > { %v477_v47 = vpop.permute.xlu1 %476  ;;  %v458_v45 = vpop.permute.xlu0 %457  ;;  %v586_v48 = vpack.c.bf16 %v479_v44, %v460_v43  ;;  %v583_v50 = vpack.c.bf16 %v442_v46, %v1268_v2  ;;  %v588_v55 = vpack.c.bf16 %v481_v49, %v462_v54 }
  0xb5   : > { %v482_v51 = vsel %vm478_vm8, %v1129_v40, %v477_v47  ;;  %v463_v52 = vsel %vm459_vm7, %v1124_v42, %v458_v45 }
  0xb6   : > { %v589_v53 = vpack.c.bf16 %v482_v51, %v463_v52  ;;  %633 = vmatpush1.bf16.msra.mxu0 %v586_v48 }
  0xb7   : > { %634 = vmatprep.subr.bf16.mxu0 %v583_v50 }
  0xb8   : > { %v1137_v56 = vpop.permute.xlu0 %1136  ;;  %673 = vmatprep.subr.bf16.mxu1 %v589_v53  ;;  %v439_v57 = vpop.permute.xlu1 %438 }
  0xb9   : > { %v1139_v58 = vunpack.i.h.bf16 %v1137_v56  ;;  %v1138_v59 = vunpack.i.l.bf16 %v1137_v56  ;;  %674 = vmatpush1.bf16.msra.mxu1 %v588_v55 }
  0xbb   : > { %v444_v60 = vsel %vm440_vm9, %v1139_v58, %v439_v57  ;;  %v441_v2 = vsel %vm440_vm9, %v1138_v59, %v1133_v39  ;;  %v443_v61 = vsel %vm440_vm9, %v1134_v38, %v1139_v58 }
  0xbc   : > { %v585_v62 = vpack.c.bf16 %v444_v60, %v1272_v4  ;;  %v582_v63 = vpack.c.bf16 %v441_v2, %v1274_v5  ;;  %v584_v0 = vpack.c.bf16 %v443_v61, %v1270_v3  ;;  %v711_v4 = vsub.s32 1, %v706_v7 }
  0xbd   : > { %v708_v5 = vrot.slane %v1295_v14, %v707_v8  ;;  %v719_v3 = vsub.s32 3, %v706_v7 }
  0xbe   : > { %635 = vmatpush1.bf16.msra.mxu0 %v582_v63  ;;  %675 = vmatprep.subr.bf16.mxu1 %v585_v62  ;;  %v712_v11 = vrot.slane %v1295_v14, %v711_v4 }
  0xbf   : > { %676 = vmatpush1.bf16.msra.mxu1 %v584_v0  ;;  %vm721_vm11 = vcmp.eq.s32.totalorder %v708_v5, 1  ;;  %v720_v12 = vrot.slane %v1295_v14, %v719_v3 }
  0xc0   : > { %vm722_vm13 = vcmp.eq.s32.totalorder %v712_v11, 1 }
  0xc1   : > { %995 = vmatmul.mubr.msk.bf16.vlgmr.msra.gmra.mxu0 %vm603_vm10, %v602_v1  ;;  %vm724_vm14 = vcmp.eq.s32.totalorder %v720_v12, 1 }
  0xc2   : > { %997 = vmatmul.mubr.msk.bf16.vlgmr.msra.gmra.mxu1 %vm603_vm10, %v602_v1 }
 0x181   : > { %v654_v13 = vpop.f32.mrf.mxu0 }
 0x182   : > { %v725_v15 = vsel %vm721_vm11, %v654_v13, 0.0  ;;  %v695_v16 = vpop.f32.mrf.mxu1 }
 0x183   : > { %v727_v18 = vsel %vm723_vm12, %v695_v16, 0.0  ;;  %v656_v19 = vpop.f32.mrf.mxu0  ;;  %v736_v20 = vmul.f32 %v725_v15, %v725_v15 }
 0x184   : > { %v726_v21 = vsel %vm722_vm13, %v656_v19, 0.0  ;;  %v1008_v17 = vpack.c.bf16 %v656_v19, %v654_v13  ;;  %v697_v22 = vpop.f32.mrf.mxu1  ;;  %v738_v23 = vmul.f32 %v727_v18, %v727_v18 }
 0x185   : > { %v729_v24 = vadd.f32 %v726_v21, %v725_v15  ;;  %v737_v14 = vmul.f32 %v726_v21, %v726_v21  ;;  %v1009_v25 = vpack.c.bf16 %v697_v22, %v695_v16  ;;  %v658_v26 = vpop.f32.mrf.mxu0  ;;  %v728_v27 = vsel %vm724_vm14, %v697_v22, 0.0 }
 0x186   : > { %762 = vst [vmem:[%s398_s20] sm:$0xff] %v1008_v17  ;;  %v699_v28 = vpop.f32.mrf.mxu1  ;;  %v739_v33 = vmul.f32 %v728_v27, %v728_v27 }
 0x187   : > { %v740_v29 = vadd.f32 %v737_v14, %v736_v20  ;;  %763 = vst [vmem:[%s398_s20 + $0x8] sm:$0xff] %v1009_v25  ;;  %v659_v30 = vpop.f32.mrf.mxu0  ;;  %v730_v31 = vadd.f32 %v729_v24, %v727_v18 }
 0x188   : > { %v700_v32 = vpop.f32.mrf.mxu1 }
 0x189   : > { %v731_v34 = vadd.f32 %v730_v31, %v728_v27  ;;  %v741_v35 = vadd.f32 %v740_v29, %v738_v23 }
 0x18b   : > { %732 = vadd.xlane.f32.xlu0 %v731_v34  ;;  %v742_v36 = vadd.f32 %v741_v35, %v739_v33 }
 0x18d   : > { %743 = vadd.xlane.f32.xlu1 %v742_v36 }
 0x214   : > { %v733_v37 = vpop.xlane.xlu0 %732 }
 0x215   : > { %735 = vst.msk [vmem:[%s407_s9] sm:$0xff] %vm734_vm15, %v733_v37 }
 0x216   : > { %v744_v38 = vpop.xlane.xlu1 %743 }
 0x217   : > { %745 = vst.msk [vmem:[%s415_s12] sm:$0xff] %vm734_vm15, %v744_v38 }
 0x218 PF: > { %s17_s25 = sadd.s32 1, %s1178_s25   ;;  %s1388_s21 = smov %s1170_s23 }
 0x219   : > { %p14_p10 = scmp.ge.s32.totalorder %s17_s25, 6   ;;  %s1389_s22 = smov %s1174_s24 }
 0x21a   : > { %s1390_s23 = smov %s1393_s26  ;;  %s1391_s24 = smov %s1397_s27 }
 0x21b   :  { %16 = sbr.rel (!%p14_p10) target bundleno = 3 (0x3), region = 96 }

// kernel: double_conv_up.3
= control target key start
LH: loop header
LB: loop body
LE: loop exit
PB: predicated region body
PF: predicated region fallthrough
CT: control target
= control target key end

     0   :  { %s1440_s30 = smov 0   ;;  %s1442_s10 = smov 0   ;;  %s1627_s0 = inlined_call_operand.vmem [shape: bf16[2,8,1024], index: 0, kind: input, shape index: {}, may-alias: {0,1}]   ;;  %s1628_s1 = inlined_call_operand.vmem [shape: bf16[2,8,1024], index: 1, kind: input, shape index: {}, may-alias: {0,1}]   ;;  %s1629_s2 = inlined_call_operand.vmem [shape: f32[8,1], index: 2, kind: input, shape index: {}]   ;;  %s1630_s3 = inlined_call_operand.vmem [shape: f32[8,1], index: 3, kind: input, shape index: {}]   ;;  %s1631_s4 = inlined_call_operand.vmem [shape: bf16[8,72], index: 4, kind: input, shape index: {}]   ;;  %s1632_s5 = inlined_call_operand.vmem [shape: f32[1,1024], index: 5, kind: input, shape index: {}, may-alias: {5,6}]   ;;  %s1633_s6 = inlined_call_operand.vmem [shape: f32[1,1024], index: 6, kind: input, shape index: {}, may-alias: {5,6}]   ;;  %s1634_s7 = inlined_call_operand.vmem [shape: bf16[2,8,512], index: 7, kind: output, shape index: {0}]   ;;  %s1635_s8 = inlined_call_operand.vmem [shape: f32[2,1,8,1], index: 8, kind: output, shape index: {1}]   ;;  %s1636_s9 = inlined_call_operand.vmem [shape: f32[2,1,8,1], index: 9, kind: output, shape index: {2}]  }
   0x1   :  { %s1444_s11 = smov 0  }
   0x2 LB: > { %s32_s12 = sadd.s32 1, %s1373_s10  ;;  %p1202_p0 = scmp.ge.s32.totalorder %s1377_s11, 1  ;;  %s1377_s11 = sphi %s1444_s11, %s20_s11   ;;  %s1373_s10 = sphi %s1442_s10, %s1648_s10   ;;  %s1369_s30 = sphi %s1440_s30, %s1647_s30  }
   0x3   : > { %p34_p1 = scmp.ge.s32.totalorder %s32_s12, 2  ;;  %p366_p2 = scmp.lt.s32.totalorder %s1377_s11, 3 }
   0x5   : > { %s1650_s12 = smov (%p34_p1, %s32_s12), 0  ;;  %p367_p3 = pnand %p1202_p0, %p366_p2 }
   0x6   : > { %p444_p4 = scmp.lt.s32.totalorder (!%p367_p3), %s1369_s30, 1  ;;  %s1380_s29 = smov (!%p367_p3), 90  }
   0x7   : > { %370 = sbr.rel (%p367_p3) target bundleno = 901 (0x385), region = 48  ;;  %s1381_s13 = smov (!%p367_p3), 91  }
   0x8   : > { %s1382_s14 = smov (!%p367_p3), 92   ;;  %s1383_s15 = smov (!%p367_p3), 108  }
   0x9   : > { %s1384_s16 = smov (!%p367_p3), 109   ;;  %s1385_s17 = smov (!%p367_p3), 110  }
   0xa   : > { %s1386_s18 = smov (!%p367_p3), 126  }
   0xc   : > { %v533_v0 = vld [vmem:[%s1629_s2] sm:$0xff]  ;;  %v1379_v1 = vmov 0   ;;  %v513_v3 = vlaneseq  ;;  %s1652_s30 = smov (!%p444_p4, %s1369_s30), 1  ;;  %vm748_vm10 = vcmask 736256   ;;  %vm782_vm11 = vcmask 1043456  }
   0xd   : > { %1274 = vset.pattern.permute.xlu0 %v1379_v1  ;;  %827 = vmatprep.mubr.bf16.mxu0 %v1379_v1  ;;  %v544_v2 = vld [vmem:[%s1630_s3] sm:$0xff]  ;;  %s1232_s19 = sshll.u32 %s1652_s30, 5  ;;  %vm729_vm12 = vcmask 744448   ;;  %vm710_vm13 = vcmask 752640   ;;  %vm691_vm14 = vcmask 883712   ;;  %vm672_vm15 = vcmask 891904  }
   0xe   : > { %536 = vperm.xlu0 %1274, %v533_v0   ;;  %868 = vmatprep.mubr.bf16.mxu1 %v1379_v1  ;;  %v514_v4 = vshrl.u32 %v513_v3, 7  ;;  %v510_v6 = vld [vmem:[%s1632_s5] sm:$0xf]  ;;  %s1234_s20 = sadd.s32 16, %s1232_s19  ;;  %s451_s23 = scalar_lea.vmem %s1627_s0, %s1232_s19  ;;  %v1211_v11 = vld [vmem:[%s1633_s6 + $0x4] sm:$0x1] }
   0xf   : > { %s462_s28 = scalar_lea.vmem %s1628_s1, %s1234_s20  ;;  %v502_v15 = vld [vmem:[%s451_s23] sm:$0xff]  ;;  %vm559_vm1 = vcmp.gt.f32.partialorder %v1211_v11, 0.5  ;;  %v503_v16 = vld [vmem:[%s451_s23 + $0x8] sm:$0xff]  ;;  %s1387_s19 = smov 127  }
  0x10   : > { %v515_v5 = vsub.s32 0, %v514_v4  ;;  %v519_v7 = vsub.s32 1, %v514_v4  ;;  %v523_v8 = vsub.s32 2, %v514_v4  ;;  %v527_v10 = vsub.s32 3, %v514_v4  ;;  %v508_v17 = vld [vmem:[%s462_s28] sm:$0xf] }
  0x11   : > { %v504_v19 = vunpack.c.l.bf16 %v502_v15  ;;  %v505_v20 = vunpack.c.h.bf16 %v502_v15  ;;  %v569_v21 = vsel %vm559_vm1, 1, %v1379_v1  ;;  %v506_v22 = vunpack.c.l.bf16 %v503_v16  ;;  %s1235_s22 = sshll.u32 %s1652_s30, 4  ;;  %s1389_s23 = smov 19  }
  0x12   : > { %547 = vperm.xlu0 %1274, %v544_v2   ;;  %v516_v9 = vrot.slane %v510_v6, %v515_v5  ;;  %v520_v12 = vrot.slane %v510_v6, %v519_v7  ;;  %v524_v13 = vrot.slane %v510_v6, %v523_v8  ;;  %v528_v14 = vrot.slane %v510_v6, %v527_v10  ;;  %s485_s26 = scalar_lea.vmem %s1634_s7, %s1235_s22  ;;  %s1209_s27 = sshll.u32 %s1652_s30, 3 }
  0x13   : > { %v507_v23 = vunpack.c.h.bf16 %v503_v16  ;;  %v509_v27 = vunpack.c.l.bf16 %v508_v17  ;;  %v589_v32 = vrot.slane %v569_v21, %v515_v5  ;;  %vm634_vm1 = vcmask 1031168  }
  0x14   : > { %vm555_vm0 = vcmp.gt.f32.partialorder %v516_v9, 0.5  ;;  %vm556_vm2 = vcmp.gt.f32.partialorder %v520_v12, 0.5  ;;  %vm557_vm3 = vcmp.gt.f32.partialorder %v524_v13, 0.5  ;;  %vm558_vm4 = vcmp.gt.f32.partialorder %v528_v14, 0.5 }
  0x15   : > { %v565_v18 = vsel %vm555_vm0, 1, %v1379_v1  ;;  %v566_v24 = vsel %vm556_vm2, 1, %v1379_v1  ;;  %v567_v25 = vsel %vm557_vm3, 1, %v1379_v1  ;;  %v568_v29 = vsel %vm558_vm4, 1, %v1379_v1 }
  0x16   : > { %v573_v28 = vrot.slane %v565_v18, %v515_v5  ;;  %v577_v30 = vrot.slane %v566_v24, %v515_v5  ;;  %v581_v31 = vrot.slane %v567_v25, %v515_v5  ;;  %v585_v39 = vrot.slane %v568_v29, %v515_v5 }
  0x17   : > { %vm1499_vm8 = vcmp.eq.s32.totalorder %v589_v32, 1  ;;  %vm653_vm0 = vcmask 900096   ;;  %vm615_vm2 = vcmask 1039360   ;;  %vm1388_vm3 = vmmov 1  }
  0x18   : > { %vm1479_vm5 = vcmp.eq.s32.totalorder %v573_v28, 1  ;;  %vm1491_vm6 = vcmp.eq.s32.totalorder %v577_v30, 1  ;;  %vm1495_vm7 = vcmp.eq.s32.totalorder %v581_v31, 1  ;;  %vm1507_vm9 = vcmp.eq.s32.totalorder %v585_v39, 1 }
  0x19   : > { %vm1213_vm4 = vmpackc.low %vm1388_vm3, %vm1491_vm6 }
  0x89   : > { %v537_v26 = vpop.permute.xlu0 %536 }
  0x8a   : > { %v539_v33 = vmul.f32 %v537_v26, %v504_v19  ;;  %v540_v34 = vmul.f32 %v537_v26, %v505_v20  ;;  %v541_v35 = vmul.f32 %v537_v26, %v506_v22  ;;  %v542_v36 = vmul.f32 %v537_v26, %v507_v23 }
  0x8b   : > { %v543_v37 = vmul.f32 %v537_v26, %v509_v27 }
  0x8d   : > { %v548_v38 = vpop.permute.xlu0 %547 }
  0x8e   : > { %v1483_v41 = vadd.f32 %v548_v38, %v539_v33  ;;  %v1485_v42 = vadd.f32 %v548_v38, %v540_v34  ;;  %v1487_v43 = vadd.f32 %v548_v38, %v541_v35  ;;  %v1489_v44 = vadd.f32 %v548_v38, %v542_v36 }
  0x8f   : > { %v554_v45 = vadd.f32 %v548_v38, %v543_v37 }
  0x90   : > { %v560_v49 = vmax.f32 %v1483_v41, 0.0  ;;  %v561_v50 = vmax.f32 %v1485_v42, 0.0  ;;  %v562_v51 = vmax.f32 %v1487_v43, 0.0  ;;  %v563_v52 = vmax.f32 %v1489_v44, 0.0  ;;  %v777_v41 = vld [vmem:[%s1631_s4] sm:$0xf] }
  0x91   : > { %v564_v53 = vmax.f32 %v554_v45, 0.0 }
  0x92   : > { %v595_v55 = vsel %vm1479_vm5, %v560_v49, 0.0  ;;  %v596_v56 = vsel %vm1491_vm6, %v561_v50, 0.0  ;;  %v597_v57 = vsel %vm1495_vm7, %v562_v51, 0.0  ;;  %v598_v60 = vsel %vm1507_vm9, %v563_v52, 0.0 }
  0x93   : > { %v599_v58 = vsel %vm1499_vm8, %v564_v53, 0.0  ;;  %v1275_v59 = vpack.i.bf16 %v596_v56, %v595_v55  ;;  %v1290_v61 = vpack.i.bf16 %v597_v57, %v596_v56  ;;  %v1280_v62 = vpack.i.bf16 %v598_v60, %v597_v57 }
  0x94   : > { %746 = vrot.lane.b32.xlu0 %v599_v58, %s1380_s29  ;;  %v1300_v63 = vpack.i.bf16 %v598_v60, %v595_v55 }
  0x95   : > { %1276 = vrot.lane.b32.xlu1 %v1275_v59, %s1380_s29 }
  0x98   : > { %1291 = vrot.lane.b32.xlu0 %v1290_v61, %s1381_s13 }
  0x99   : > { %1281 = vrot.lane.b32.xlu1 %v1280_v62, %s1380_s29 }
  0x9c   : > { %1301 = vrot.lane.b32.xlu0 %v1300_v63, %s1381_s13 }
  0x9d   : > { %1286 = vrot.lane.b32.xlu1 %v1290_v61, %s1382_s14 }
  0xa0   : > { %727 = vrot.lane.b32.xlu0 %v599_v58, %s1381_s13  ;;  %s493_s13 = scalar_lea.vmem %s1635_s8, %s1209_s27 }
  0xa1   : > { %1296 = vrot.lane.b32.xlu1 %v1300_v63, %s1382_s14 }
  0xa4   : > { %1311 = vrot.lane.b32.xlu0 %v1290_v61, %s1383_s15 }
  0xa5   : > { %708 = vrot.lane.b32.xlu1 %v599_v58, %s1382_s14 }
  0xa8   : > { %1321 = vrot.lane.b32.xlu0 %v1300_v63, %s1383_s15 }
  0xa9   : > { %1306 = vrot.lane.b32.xlu1 %v1290_v61, %s1384_s16 }
  0xac   : > { %689 = vrot.lane.b32.xlu0 %v599_v58, %s1383_s15 }
  0xad   : > { %1316 = vrot.lane.b32.xlu1 %v1300_v63, %s1384_s16 }
  0xb0   : > { %1331 = vrot.lane.b32.xlu0 %v1290_v61, %s1385_s17 }
  0xb1   : > { %670 = vrot.lane.b32.xlu1 %v599_v58, %s1384_s16 }
  0xb4   : > { %1341 = vrot.lane.b32.xlu0 %v1300_v63, %s1385_s17 }
  0xb5   : > { %1326 = vrot.lane.b32.xlu1 %v1290_v61, %s1386_s18 }
  0xb8   : > { %651 = vrot.lane.b32.xlu0 %v599_v58, %s1385_s17 }
  0xb9   : > { %1336 = vrot.lane.b32.xlu1 %v1300_v63, %s1386_s18 }
  0xbc   : > { %1351 = vrot.lane.b32.xlu0 %v1300_v63, %s1387_s19 }
  0xbd   : > { %632 = vrot.lane.b32.xlu1 %v599_v58, %s1386_s18 }
  0xc1   : > { %1346 = vrot.lane.b32.xlu1 %v1290_v61, %s1387_s19 }
  0xc5   : > { %613 = vrot.lane.b32.xlu1 %v599_v58, %s1387_s19 }
 0x106   : > { %v747_v0 = vpop.permute.xlu0 %746 }
 0x107   : > { %v1277_v1 = vpop.permute.xlu1 %1276 }
 0x108   : > { %v1279_v2 = vunpack.i.h.bf16 %v1277_v1  ;;  %v1278_v3 = vunpack.i.l.bf16 %v1277_v1 }
 0x10a   : > { %v1292_v4 = vpop.permute.xlu0 %1291  ;;  %v749_v5 = vsel %vm748_vm10, %v1278_v3, %v1279_v2 }
 0x10b   : > { %v1282_v6 = vpop.permute.xlu1 %1281  ;;  %v1294_v9 = vunpack.i.h.bf16 %v1292_v4  ;;  %v773_v10 = vpack.c.bf16 %v749_v5, %v749_v5  ;;  %v1293_v11 = vunpack.i.l.bf16 %v1292_v4 }
 0x10c   : > { %v1284_v7 = vunpack.i.h.bf16 %v1282_v6  ;;  %v1283_v8 = vunpack.i.l.bf16 %v1282_v6 }
 0x10d   : > { %v784_v22 = vsel %vm782_vm11, %v773_v10, 0  ;;  %v731_v27 = vsel %vm729_vm12, %v1293_v11, %v1294_v9 }
 0x10e   : > { %v1302_v12 = vpop.permute.xlu0 %1301  ;;  %v750_v13 = vsel %vm748_vm10, %v1279_v2, %v1283_v8  ;;  %v752_v14 = vsel %vm748_vm10, %v1284_v7, %v747_v0  ;;  %v751_v15 = vsel %vm748_vm10, %v1283_v8, %v1284_v7  ;;  %vm1216_vm10 = vmpackc.low %vm1388_vm3, %vm1479_vm5 }
 0x10f   : > { %v1287_v16 = vpop.permute.xlu1 %1286  ;;  %v774_v17 = vpack.c.bf16 %v750_v13, %v750_v13  ;;  %v776_v18 = vpack.c.bf16 %v752_v14, %v752_v14  ;;  %v775_v21 = vpack.c.bf16 %v751_v15, %v751_v15  ;;  %v1303_v23 = vunpack.i.l.bf16 %v1302_v12 }
 0x110   : > { %v1289_v19 = vunpack.i.h.bf16 %v1287_v16  ;;  %v1288_v20 = vunpack.i.l.bf16 %v1287_v16  ;;  %v1304_v32 = vunpack.i.h.bf16 %v1302_v12 }
 0x111   : > { %1212 = vmatprep.subr.msk.bf16.mxu0 %vm782_vm11, %v774_v17  ;;  %1220 = vmatprep.subr.msk.bf16.mxu1 %vm782_vm11, %v776_v18  ;;  %v790_v25 = vsel %vm782_vm11, %v775_v21, 0  ;;  %v730_v35 = vsel %vm729_vm12, %v1303_v23, %v1293_v11  ;;  %vm1221_vm11 = vmpackc.low %vm1388_vm3, %vm1507_vm9 }
 0x112   : > { %v728_v24 = vpop.permute.xlu0 %727  ;;  %802 = vmatpush1.bf16.msra.mxu0 %v784_v22  ;;  %v712_v26 = vsel %vm710_vm13, %v1288_v20, %v1289_v19  ;;  %843 = vmatpush1.bf16.msra.mxu1 %v790_v25  ;;  %v732_v55 = vsel %vm729_vm12, %v1294_v9, %v1304_v32 }
 0x113   : > { %v1297_v28 = vpop.permute.xlu1 %1296  ;;  %v770_v29 = vpack.c.bf16 %v731_v27, %v712_v26  ;;  %v733_v39 = vsel %vm729_vm12, %v1304_v32, %v728_v24  ;;  %vm1224_vm12 = vmpackc.low %vm1388_vm3, %vm1495_vm7 }
 0x114   : > { %v1299_v30 = vunpack.i.h.bf16 %v1297_v28  ;;  %v1298_v31 = vunpack.i.l.bf16 %v1297_v28 }
 0x115   : > { %803 = vmatprep.subr.bf16.mxu0 %v770_v29 }
 0x116   : > { %v1312_v33 = vpop.permute.xlu0 %1311  ;;  %v711_v34 = vsel %vm710_vm13, %v1298_v31, %v1288_v20  ;;  %v713_v38 = vsel %vm710_vm13, %v1289_v19, %v1299_v30 }
 0x117   : > { %v709_v36 = vpop.permute.xlu1 %708  ;;  %v769_v37 = vpack.c.bf16 %v730_v35, %v711_v34  ;;  %v1314_v56 = vunpack.i.h.bf16 %v1312_v33  ;;  %v1313_v57 = vunpack.i.l.bf16 %v1312_v33  ;;  %v771_v59 = vpack.c.bf16 %v732_v55, %v713_v38 }
 0x118   : > { %v714_v45 = vsel %vm710_vm13, %v1299_v30, %v709_v36  ;;  %vm778_vm13 = vcmask 588800  }
 0x119   : > { %v772_v53 = vpack.c.bf16 %v733_v39, %v714_v45  ;;  %804 = vmatpush1.bf16.msra.mxu0 %v769_v37  ;;  %v693_v2 = vsel %vm691_vm14, %v1313_v57, %v1314_v56 }
 0x11a   : > { %v1322_v58 = vpop.permute.xlu0 %1321 }
 0x11b   : > { %v1307_v60 = vpop.permute.xlu1 %1306  ;;  %844 = vmatprep.subr.bf16.mxu1 %v772_v53  ;;  %v1323_v63 = vunpack.i.l.bf16 %v1322_v58  ;;  %v1324_v7 = vunpack.i.h.bf16 %v1322_v58 }
 0x11c   : > { %v1309_v61 = vunpack.i.h.bf16 %v1307_v60  ;;  %v1308_v62 = vunpack.i.l.bf16 %v1307_v60  ;;  %845 = vmatpush1.bf16.msra.mxu1 %v771_v59 }
 0x11d   : > { %v692_v10 = vsel %vm691_vm14, %v1323_v63, %v1313_v57  ;;  %v694_v17 = vsel %vm691_vm14, %v1314_v56, %v1324_v7 }
 0x11e   : > { %v690_v0 = vpop.permute.xlu0 %689  ;;  %v674_v1 = vsel %vm672_vm15, %v1308_v62, %v1309_v61 }
 0x11f   : > { %v1317_v3 = vpop.permute.xlu1 %1316  ;;  %v766_v4 = vpack.c.bf16 %v693_v2, %v674_v1  ;;  %v695_v14 = vsel %vm691_vm14, %v1324_v7, %v690_v0  ;;  %vm889_vm14 = vcmask 154624  }
 0x120   : > { %v1319_v5 = vunpack.i.h.bf16 %v1317_v3  ;;  %v1318_v6 = vunpack.i.l.bf16 %v1317_v3 }
 0x121   : > { %805 = vmatprep.subr.bf16.mxu0 %v766_v4 }
 0x122   : > { %v1332_v8 = vpop.permute.xlu0 %1331  ;;  %v673_v9 = vsel %vm672_vm15, %v1318_v6, %v1308_v62  ;;  %v675_v13 = vsel %vm672_vm15, %v1309_v61, %v1319_v5 }
 0x123   : > { %v671_v11 = vpop.permute.xlu1 %670  ;;  %v765_v12 = vpack.c.bf16 %v692_v10, %v673_v9  ;;  %v1334_v18 = vunpack.i.h.bf16 %v1332_v8  ;;  %v1333_v19 = vunpack.i.l.bf16 %v1332_v8  ;;  %v767_v21 = vpack.c.bf16 %v694_v17, %v675_v13 }
 0x124   : > { %v676_v15 = vsel %vm672_vm15, %v1319_v5, %v671_v11 }
 0x125   : > { %v768_v16 = vpack.c.bf16 %v695_v14, %v676_v15  ;;  %806 = vmatpush1.bf16.msra.mxu0 %v765_v12  ;;  %v655_v27 = vsel %vm653_vm0, %v1333_v19, %v1334_v18 }
 0x126   : > { %v1342_v20 = vpop.permute.xlu0 %1341 }
 0x127   : > { %v1327_v22 = vpop.permute.xlu1 %1326  ;;  %846 = vmatprep.subr.bf16.mxu1 %v768_v16  ;;  %v1343_v25 = vunpack.i.l.bf16 %v1342_v20  ;;  %v1344_v33 = vunpack.i.h.bf16 %v1342_v20 }
 0x128   : > { %v1329_v23 = vunpack.i.h.bf16 %v1327_v22  ;;  %v1328_v24 = vunpack.i.l.bf16 %v1327_v22  ;;  %847 = vmatpush1.bf16.msra.mxu1 %v767_v21 }
 0x129   : > { %v654_v35 = vsel %vm653_vm0, %v1343_v25, %v1333_v19  ;;  %v656_v56 = vsel %vm653_vm0, %v1334_v18, %v1344_v33 }
 0x12a   : > { %v636_v26 = vsel %vm634_vm1, %v1328_v24, %v1329_v23  ;;  %v652_v28 = vpop.permute.xlu0 %651 }
 0x12b   : > { %v1337_v29 = vpop.permute.xlu1 %1336  ;;  %v762_v30 = vpack.c.bf16 %v655_v27, %v636_v26  ;;  %v657_v39 = vsel %vm653_vm0, %v1344_v33, %v652_v28 }
 0x12c   : > { %v1339_v31 = vunpack.i.h.bf16 %v1337_v29  ;;  %v1338_v32 = vunpack.i.l.bf16 %v1337_v29 }
 0x12d   : > { %807 = vmatprep.subr.bf16.mxu0 %v762_v30 }
 0x12e   : > { %v635_v34 = vsel %vm634_vm1, %v1338_v32, %v1328_v24  ;;  %v637_v38 = vsel %vm634_vm1, %v1329_v23, %v1339_v31  ;;  %v1352_v53 = vpop.permute.xlu0 %1351 }
 0x12f   : > { %v633_v36 = vpop.permute.xlu1 %632  ;;  %v761_v37 = vpack.c.bf16 %v654_v35, %v635_v34  ;;  %v763_v57 = vpack.c.bf16 %v656_v56, %v637_v38  ;;  %v1353_v59 = vunpack.i.l.bf16 %v1352_v53  ;;  %v1354_v62 = vunpack.i.h.bf16 %v1352_v53 }
 0x130   : > { %v638_v45 = vsel %vm634_vm1, %v1339_v31, %v633_v36 }
 0x131   : > { %v764_v55 = vpack.c.bf16 %v657_v39, %v638_v45  ;;  %808 = vmatpush1.bf16.msra.mxu0 %v761_v37 }
 0x133   : > { %v1347_v58 = vpop.permute.xlu1 %1346  ;;  %848 = vmatprep.subr.bf16.mxu1 %v764_v55 }
 0x134   : > { %v1349_v60 = vunpack.i.h.bf16 %v1347_v58  ;;  %v1348_v61 = vunpack.i.l.bf16 %v1347_v58  ;;  %849 = vmatpush1.bf16.msra.mxu1 %v763_v57 }
 0x136   : > { %v617_v63 = vsel %vm615_vm2, %v1348_v61, %v1349_v60  ;;  %v616_v0 = vsel %vm615_vm2, %v1353_v59, %v1348_v61  ;;  %v618_v4 = vsel %vm615_vm2, %v1349_v60, %v1354_v62 }
 0x137   : > { %v614_v1 = vpop.permute.xlu1 %613  ;;  %v1214_v2 = vpack.c.bf16 %v617_v63, %v561_v50  ;;  %v1217_v3 = vpack.c.bf16 %v616_v0, %v560_v49  ;;  %v1225_v42 = vpack.c.bf16 %v618_v4, %v562_v51 }
 0x138   : > { %v619_v5 = vsel %vm615_vm2, %v1354_v62, %v614_v1 }
 0x139   : > { %v1222_v6 = vpack.c.bf16 %v619_v5, %v563_v52  ;;  %1215 = vmatprep.subr.msk.bf16.mxu0 %vm1213_vm4, %v1214_v2 }
 0x13a   : > { %1218 = vmatpush1.bf16.msk.msra.mxu0 %vm1216_vm10, %v1217_v3 }
 0x13b   : > { %1223 = vmatprep.subr.msk.bf16.mxu1 %vm1221_vm11, %v1222_v6 }
 0x13c   : > { %1226 = vmatpush1.bf16.msk.msra.mxu1 %vm1224_vm12, %v1225_v42 }
 0x13d   : > { %1219 = vmatmul.mubr.msk.bf16.vlgmr.msra.gmra.mxu0 %vm778_vm13, %v777_v41 }
 0x13f   : > { %1227 = vmatmul.mubr.msk.bf16.vlgmr.msra.gmra.mxu1 %vm778_vm13, %v777_v41 }
 0x1fd   : > { %v829_v44 = vpop.f32.mrf.mxu0 }
 0x1fe   : > { %881 = vrot.lane.b32.xlu0 %v829_v44, %s1389_s23 }
 0x1ff   : > { %v831_v49 = vpop.f32.mrf.mxu0  ;;  %v870_v43 = vpop.f32.mrf.mxu1 }
 0x200   : > { %v1236_v50 = vpack.c.bf16 %v831_v49, %v829_v44  ;;  %883 = vrot.lane.b32.xlu1 %v831_v49, %s1389_s23 }
 0x201   : > { %v833_v51 = vpop.f32.mrf.mxu0  ;;  %v872_v52 = vpop.f32.mrf.mxu1 }
 0x202   : > { %983 = vst [vmem:[%s485_s26] sm:$0xff] %v1236_v50  ;;  %v1237_v7 = vpack.c.bf16 %v872_v52, %v870_v43  ;;  %885 = vrot.lane.b32.xlu0 %v870_v43, %s1389_s23 }
 0x203   : > { %v834_v8 = vpop.f32.mrf.mxu0  ;;  %v874_v9 = vpop.f32.mrf.mxu1 }
 0x204   : > { %984 = vst [vmem:[%s485_s26 + $0x8] sm:$0xff] %v1237_v7  ;;  %887 = vrot.lane.b32.xlu1 %v872_v52, %s1389_s23 }
 0x205   : > { %v875_v10 = vpop.f32.mrf.mxu1 }
 0x270   : > { %v882_v11 = vpop.permute.xlu0 %881 }
 0x271   : > { %v898_v12 = vsel %vm1479_vm5, %v882_v11, 0.0  ;;  %vm931_vm5 = vcmask 7168  }
 0x272   : > { %908 = vrot.lane.b32.xlu0 %v898_v12, %s1384_s16  ;;  %v933_v13 = vmul.f32 %v898_v12, %v898_v12  ;;  %v884_v14 = vpop.permute.xlu1 %883 }
 0x273   : > { %v890_v15 = vsel %vm889_vm14, %v882_v11, %v884_v14 }
 0x274   : > { %v886_v16 = vpop.permute.xlu0 %885  ;;  %943 = vrot.lane.b32.xlu1 %v933_v13, %s1384_s16  ;;  %v899_v40 = vsel %vm1491_vm6, %v890_v15, 0.0 }
 0x275   : > { %v891_v17 = vsel %vm889_vm14, %v884_v14, %v886_v16  ;;  %v934_v23 = vmul.f32 %v899_v40, %v899_v40 }
 0x276   : > { %v888_v18 = vpop.permute.xlu1 %887  ;;  %v900_v19 = vsel %vm1495_vm7, %v891_v17, 0.0 }
 0x277   : > { %v892_v20 = vsel %vm889_vm14, %v886_v16, %v888_v18  ;;  %912 = vrot.lane.b32.xlu0 %v900_v19, %s1384_s16  ;;  %v935_v21 = vmul.f32 %v900_v19, %v900_v19  ;;  %v902_v47 = vsel %vm1499_vm8, %v888_v18, 0.0 }
 0x278   : > { %910 = vrot.lane.b32.xlu1 %v899_v40, %s1384_s16  ;;  %v901_v22 = vsel %vm1507_vm9, %v892_v20, 0.0  ;;  %v937_v46 = vmul.f32 %v902_v47, %v902_v47 }
 0x279   : > { %v936_v24 = vmul.f32 %v901_v22, %v901_v22 }
 0x27b   : > { %914 = vrot.lane.b32.xlu0 %v901_v22, %s1384_s16 }
 0x27c   : > { %947 = vrot.lane.b32.xlu1 %v935_v21, %s1384_s16 }
 0x27f   : > { %945 = vrot.lane.b32.xlu0 %v934_v23, %s1384_s16 }
 0x280   : > { %949 = vrot.lane.b32.xlu1 %v936_v24, %s1384_s16 }
 0x283   : > { %916 = vrot.lane.b32.xlu0 %v902_v47, %s1384_s16 }
 0x284   : > { %951 = vrot.lane.b32.xlu1 %v937_v46, %s1384_s16  ;;  %s500_s16 = scalar_lea.vmem %s1636_s9, %s1209_s27 }
 0x2e4   : > { %v909_v54 = vpop.permute.xlu0 %908 }
 0x2e6   : > { %v944_v25 = vpop.permute.xlu1 %943 }
 0x2e9   : > { %v913_v26 = vpop.permute.xlu0 %912 }
 0x2ea   : > { %v911_v27 = vpop.permute.xlu1 %910 }
 0x2eb   : > { %v918_v29 = vsel %vm672_vm15, %v909_v54, %v911_v27  ;;  %v919_v30 = vsel %vm672_vm15, %v911_v27, %v913_v26 }
 0x2ec   : > { %v926_v32 = vadd.f32 %v919_v30, %v918_v29 }
 0x2ed   : > { %v915_v28 = vpop.permute.xlu0 %914 }
 0x2ee   : > { %v948_v31 = vpop.permute.xlu1 %947  ;;  %v920_v33 = vsel %vm672_vm15, %v913_v26, %v915_v28 }
 0x2ef   : > { %v927_v39 = vadd.f32 %v926_v32, %v920_v33 }
 0x2f1   : > { %v946_v48 = vpop.permute.xlu0 %945 }
 0x2f2   : > { %v953_v34 = vsel %vm672_vm15, %v944_v25, %v946_v48  ;;  %v954_v35 = vsel %vm672_vm15, %v946_v48, %v948_v31  ;;  %v950_v36 = vpop.permute.xlu1 %949 }
 0x2f3   : > { %v961_v37 = vadd.f32 %v954_v35, %v953_v34  ;;  %v955_v38 = vsel %vm672_vm15, %v948_v31, %v950_v36 }
 0x2f5   : > { %v962_v45 = vadd.f32 %v961_v37, %v955_v38  ;;  %v917_v53 = vpop.permute.xlu0 %916 }
 0x2f6   : > { %v921_v55 = vsel %vm672_vm15, %v915_v28, %v917_v53  ;;  %v952_v56 = vpop.permute.xlu1 %951 }
 0x2f7   : > { %v956_v57 = vsel %vm672_vm15, %v950_v36, %v952_v56  ;;  %v928_v58 = vadd.f32 %v927_v39, %v921_v55 }
 0x2f8   : > { %v963_v59 = vadd.f32 %v962_v45, %v956_v57 }
 0x2f9   : > { %929 = vadd.xlane.f32.xlu0 %v928_v58 }
 0x2fa   : > { %964 = vadd.xlane.f32.xlu1 %v963_v59 }
 0x382   : > { %v930_v60 = vpop.xlane.xlu0 %929 }
 0x383   : > { %932 = vst.msk [vmem:[%s493_s13] sm:$0xff] %vm931_vm5, %v930_v60  ;;  %v965_v61 = vpop.xlane.xlu1 %964 }
 0x384   : > { %966 = vst.msk [vmem:[%s500_s16] sm:$0xff] %vm931_vm5, %v965_v61 }
 0x385 PF: > { %s20_s11 = sadd.s32 1, %s1377_s11   ;;  %s1647_s30 = smov %s1373_s10 }
 0x386   : > { %p17_p5 = scmp.ge.s32.totalorder %s20_s11, 4   ;;  %s1648_s10 = smov %s1650_s12 }
 0x388   :  { %19 = sbr.rel (!%p17_p5) target bundleno = 2 (0x2), region = 111 }

</bundles_post_ra>
